<compile_context>
chip_gen: v6e
topology: v6e:2x2x1
jax: 0.10.0
libtpu: 0.0.40
codegen_flags: <defaults>
</compile_context>

<pallas_src>
import functools

import jax
import jax.numpy as jnp
from jax.experimental import pallas as pl
from jax.experimental.pallas import tpu as pltpu


def transformer_block_kernel(
    qkv_ref,                     # (Bt, H, S, 3*hd)  fused q|k|v, head-major, compute dtype
    qres_ref,                    # (Bt, S, E)        residual query, compute dtype
    mask_ref,                    # (Bt, S, S)        int8 (0 = masked)
    wqkv_ref,                    # (3hd, 3hd)        block-diag fused proj weight (scale folded)
    wo_ref, bo_ref,              # (H, hd, E), (1, E)
    g1_ref, be1_ref,             # (1, E) LayerNorm1
    w1_ref, b1_ref,              # (E, Hf), (1, Hf)
    w2_ref, b2_ref,              # (Hf, E), (1, E)
    g2_ref, be2_ref,             # (1, E) LayerNorm2
    out_ref,                     # (Bt, S, E)
    q_scr,                       # VMEM (Bt*H, S, hd) projected (pre-scaled) q
    bias_scr,                    # VMEM (Bt, S, S) f32 additive mask bias
    *, q_block: int, approx_recip: bool,
):
    f32 = jnp.float32
    Bt, H, S, thd = qkv_ref.shape
    hd = thd // 3
    E = H * hd
    G = Bt * H
    Rb = Bt * q_block
    n_q = S // q_block
    cdt = wqkv_ref.dtype
    # masked_fill(-1e20) happens before the /sqrt(E) in the reference; the scale is folded
    # into the q projection weight, so the fill carries it too.
    fill = jnp.float32(-1e20 / (E ** 0.5))

    # --- fused QKV projection: one MXU matmul for all heads and all of q/k/v. ---------------
    x = qkv_ref[...].reshape(G * S, thd)
    qkv_p = jnp.dot(x, wqkv_ref[...], preferred_element_type=f32)        # (G*S, 3hd) f32
    q_scr[...] = qkv_p[:, 0 * hd:1 * hd].astype(cdt).reshape(G, S, hd)   # scale already folded
    k3 = qkv_p[:, 1 * hd:2 * hd].astype(cdt).reshape(G, S, hd)
    v3 = qkv_p[:, 2 * hd:3 * hd].astype(cdt).reshape(G, S, hd)

    # --- mask -> additive bias, computed once per batch block (hoisted out of the loop). ----
    bias_scr[...] = jnp.where(mask_ref[...].astype(jnp.int32) == 0, fill, jnp.float32(0.0))

    align = q_block & (-q_block)   # largest power-of-two divisor of q_block

    def qblock_body(qb, carry):
        qs = pl.multiple_of(qb * q_block, align)

        # attention scores for this query-row block, all (batch, head) pairs batched.
        qh = q_scr[:, pl.ds(qs, q_block), :]                              # (G, qb, hd)
        s = jnp.einsum("gqd,gkd->gqk", qh, k3, preferred_element_type=f32)
        s = (s.reshape(Bt, H, q_block, S)
             + bias_scr[:, pl.ds(qs, q_block), :][:, None]).reshape(G, q_block, S)

        # softmax over keys (f32).
        m = jnp.max(s, axis=-1, keepdims=True)
        p = jnp.exp(s - m)
        denom = jnp.sum(p, axis=-1, keepdims=True)
        if approx_recip:
            attn = p * pl.reciprocal(denom, approx=True)                  # EUP slot
        else:
            attn = p / denom                                              # exact path
        ctx = jnp.einsum("gqk,gkd->gqd", attn.astype(cdt), v3,
                         preferred_element_type=f32).reshape(Bt, H, q_block, hd)

        # fc_out folded over heads: no lane concat, pure MXU accumulation.
        acc = None
        for h in range(H):
            ch = ctx[:, h].reshape(Rb, hd).astype(cdt)
            d = jnp.dot(ch, wo_ref[h], preferred_element_type=f32)
            acc = d if acc is None else acc + d
        attn_out = acc + bo_ref[0]

        # residual + LayerNorm1 (dropout == identity in eval mode).
        res = qres_ref[:, pl.ds(qs, q_block), :].reshape(Rb, E).astype(f32)
        xln = attn_out + res
        mu = jnp.mean(xln, axis=-1, keepdims=True)
        var = jnp.mean((xln - mu) ** 2, axis=-1, keepdims=True)
        xln = (xln - mu) * jax.lax.rsqrt(var + 1e-5) * g1_ref[0] + be1_ref[0]

        # feed-forward: Linear -> ReLU -> Linear (hidden activation bounded by the row block).
        h1 = jnp.dot(xln.astype(cdt), w1_ref[...], preferred_element_type=f32) + b1_ref[0]
        h1 = jnp.maximum(h1, 0.0)
        ff = jnp.dot(h1.astype(cdt), w2_ref[...], preferred_element_type=f32) + b2_ref[0]

        # residual + LayerNorm2.
        y = ff + xln
        mu2 = jnp.mean(y, axis=-1, keepdims=True)
        var2 = jnp.mean((y - mu2) ** 2, axis=-1, keepdims=True)
        y = (y - mu2) * jax.lax.rsqrt(var2 + 1e-5) * g2_ref[0] + be2_ref[0]

        out_ref[:, pl.ds(qs, q_block), :] = y.reshape(Bt, q_block, E).astype(out_ref.dtype)
        return carry

    jax.lax.fori_loop(0, n_q, qblock_body, 0)


def _vmem_capacity_bytes():
    try:
        return int(pltpu.get_tpu_info().vmem_capacity_bytes)
    except Exception:
        return 64 * 1024 * 1024   # conservative default (v7x per-TC VMEM)


def _vmem_estimate_bytes(Bt, H, S, hd, E, Hf, q_block, cdt, out_dtype):
    """Rough upper bound on per-step VMEM (lane padding included, sublane padding via slack)."""
    c = jnp.dtype(cdt).itemsize
    o = jnp.dtype(out_dtype).itemsize
    lane = lambda n: -(-n // 128) * 128
    G, Rb = Bt * H, Bt * q_block
    acts = 2 * (Bt * H * S * lane(3 * hd) * c        # fused q|k|v block (double-buffered)
                + Bt * S * lane(E) * c               # residual q
                + Bt * S * lane(S)                   # int8 mask
                + Bt * S * lane(E) * o)              # output block
    weights = 2 * c * ((3 * hd) * lane(3 * hd) + H * hd * lane(E)
                       + E * lane(Hf) + Hf * lane(E))
    scratch = G * S * lane(hd) * c + Bt * S * lane(S) * 4
    work = (2 * G * S * lane(hd) + 2 * G * q_block * lane(S)
            + Rb * lane(Hf) + 8 * Rb * lane(E)) * 4
    return acts + weights + scratch + work


def transformer_block(value, key, query, mask, params, *, heads,
                      compute_dtype=jnp.bfloat16, out_dtype=jnp.float32,
                      batch_block=None, q_block=None):
    N, S, E = query.shape
    assert value.shape == key.shape == query.shape, "value/key/query must share (N, S, E)"
    assert E % heads == 0, "Embed size needs to be div by heads"
    hd = E // heads
    Hf = params["w1"].shape[0]
    cdt = jnp.dtype(compute_dtype)
    approx_recip = cdt == jnp.dtype(jnp.bfloat16)
    f32 = jnp.float32
    scale = 1.0 / (E ** 0.5)

    cap = _vmem_capacity_bytes()
    # Generation-aware row cap: 64 MiB-VMEM parts (v7x) keep smaller blocks, 128 MiB parts
    # (v5e/v6e) amortize the per-grid-step overhead with bigger ones.
    row_cap = 1024 if cap <= 64 * 1024 * 1024 else 2048

    if batch_block is None:
        divs = [d for d in range(1, N + 1) if N % d == 0 and d * S <= row_cap] or [1]
        # Keep grid extent >= 2 so the "parallel" axis shards across both v7x TensorCores
        # and input/output DMA overlaps compute.
        pref = [d for d in divs if N // d >= 2]
        batch_block = max(pref) if pref else max(divs)
    Bt = batch_block
    assert N % Bt == 0, "batch_block must divide the batch size"

    if q_block is None:
        cands = [d for d in range(8, min(S, 256) + 1, 8) if S % d == 0]
        q_block = max(cands) if cands else S
    assert S % q_block == 0 and (q_block == S or q_block % 8 == 0)

    # --- host-side layout prep (free XLA transposes / casts; kernel stays relayout-light). ---
    def to_heads(x):
        return x.reshape(N, S, heads, hd).transpose(0, 2, 1, 3)

    qkv_hm = jnp.concatenate([to_heads(query), to_heads(key), to_heads(value)],
                             axis=-1).astype(cdt)               # (N, H, S, 3*hd)
    q_res = query.astype(cdt)                                   # residual stream (bf16 fast path)
    mask_i8 = (mask != 0).astype(jnp.int8)                      # 1 byte/elem mask DMA

    # Fused projection weight: block-diagonal (3hd, 3hd) = diag(wq^T * scale, wk^T, wv^T).
    # Exact for distinct value/key/query inputs; one MXU matmul instead of three.
    w_qkv = jnp.zeros((3 * hd, 3 * hd), f32)
    w_qkv = w_qkv.at[0 * hd:1 * hd, 0 * hd:1 * hd].set(params["wq"].T * scale)
    w_qkv = w_qkv.at[1 * hd:2 * hd, 1 * hd:2 * hd].set(params["wk"].T)
    w_qkv = w_qkv.at[2 * hd:3 * hd, 2 * hd:3 * hd].set(params["wv"].T)
    w_qkv = w_qkv.astype(cdt)

    wo_heads = params["wo"].T.reshape(heads, hd, E).astype(cdt)  # fc_out split per head
    w1T = params["w1"].T.astype(cdt)
    w2T = params["w2"].T.astype(cdt)
    bo, b1, b2 = (params[k].astype(f32) for k in ("bo", "b1", "b2"))
    g1, be1, g2, be2 = (params[k].astype(f32) for k in ("g1", "be1", "g2", "be2"))

    est = _vmem_estimate_bytes(Bt, heads, S, hd, E, Hf, q_block, cdt, out_dtype)
    vmem_limit = int(min(0.9 * cap, max(32 * 1024 * 1024, 1.5 * est)))

    kernel = functools.partial(transformer_block_kernel,
                               q_block=q_block, approx_recip=approx_recip)

    def batched(shape):
        nd = len(shape)
        return pl.BlockSpec((Bt,) + tuple(shape[1:]),
                            lambda n, _nd=nd: (n,) + (0,) * (_nd - 1))

    def run(single_buffer_weights):
        def const(shape):
            nd = len(shape)
            imap = lambda n, _nd=nd: (0,) * _nd
            if single_buffer_weights:
                # Constant index_map -> never re-DMAed; single-buffer to save VMEM.
                return pl.BlockSpec(tuple(shape), imap, pipeline_mode=pl.Buffered(1))
            return pl.BlockSpec(tuple(shape), imap)

        in_specs = [
            batched((N, heads, S, 3 * hd)),    # fused q|k|v, head-major
            batched((N, S, E)),                # residual query
            batched((N, S, S)),                # int8 mask
            const((3 * hd, 3 * hd)),           # fused projection weight
            const((heads, hd, E)), const((1, E)),          # Wo (per head), bo
            const((1, E)), const((1, E)),                  # gamma1, beta1
            const((E, Hf)), const((1, Hf)),                # W1^T, b1
            const((Hf, E)), const((1, E)),                 # W2^T, b2
            const((1, E)), const((1, E)),                  # gamma2, beta2
        ]
        return pl.pallas_call(
            kernel,
            out_shape=jax.ShapeDtypeStruct((N, S, E), out_dtype),
            grid_spec=pltpu.PrefetchScalarGridSpec(
                num_scalar_prefetch=0,
                grid=(N // Bt,),
                in_specs=in_specs,
                out_specs=batched((N, S, E)),
                scratch_shapes=[
                    pltpu.VMEM((Bt * heads, S, hd), cdt),   # projected (pre-scaled) q
                    pltpu.VMEM((Bt, S, S), f32),            # additive mask bias
                ],
            ),
            compiler_params=pltpu.CompilerParams(
                dimension_semantics=("parallel",),
                vmem_limit_bytes=vmem_limit),
        )(
            qkv_hm, q_res, mask_i8,
            w_qkv, wo_heads, bo, g1, be1, w1T, b1, w2T, b2, g2, be2,
        )

    try:
        out = run(True)
        jax.block_until_ready(out)   # surface compile errors here so the fallback can engage
        return out
    except Exception:                # capability fallback: Pallas without Buffered(1) support
        return run(False)


def transformer_block_ref(value, key, query, mask, params, *, heads):
    """Pure-JAX (f32) reference for correctness checking."""
    N, S, E = query.shape
    hd = E // heads
    q4 = query.reshape(N, S, heads, hd) @ params["wq"].T
    k4 = key.reshape(N, S, heads, hd) @ params["wk"].T
    v4 = value.reshape(N, S, heads, hd) @ params["wv"].T
    energy = jnp.einsum("nqhd,nkhd->nhqk", q4, k4)
    energy = jnp.where(mask[:, None, :, :] == 0, -1e20, energy)
    attn = jax.nn.softmax(energy / jnp.sqrt(jnp.float32(E)), axis=-1)
    out = jnp.einsum("nhqk,nkhd->nqhd", attn, v4).reshape(N, S, E)
    attn_out = out @ params["wo"].T + params["bo"][0]

    def ln(x, g, b):
        mu = x.mean(-1, keepdims=True)
        var = ((x - mu) ** 2).mean(-1, keepdims=True)
        return (x - mu) * jax.lax.rsqrt(var + 1e-5) * g + b

    x = ln(attn_out + query, params["g1"][0], params["be1"][0])
    ff = jnp.maximum(x @ params["w1"].T + params["b1"][0], 0.0) @ params["w2"].T + params["b2"][0]
    return ln(ff + x, params["g2"][0], params["be2"][0])


if __name__ == "__main__":
    # Small shapes consistent with the module.
    N, S = 2, 16
    embed_size, heads, forward_expansion = 32, 4, 4
    hd = embed_size // heads
    hidden = embed_size * forward_expansion

    key0 = jax.random.PRNGKey(0)
    ks = jax.random.split(key0, 12)

    value = jax.random.normal(ks[0], (N, S, embed_size), jnp.float32)
    keyt = jax.random.normal(ks[1], (N, S, embed_size), jnp.float32)
    query = jax.random.normal(ks[2], (N, S, embed_size), jnp.float32)
    # Causal mask (1 = keep, 0 = masked), broadcast over heads.
    mask = jnp.tril(jnp.ones((S, S), jnp.float32))[None].repeat(N, axis=0)

    scale = 0.1
    params = {
        "wq": scale * jax.random.normal(ks[3], (hd, hd), jnp.float32),
        "wk": scale * jax.random.normal(ks[4], (hd, hd), jnp.float32),
        "wv": scale * jax.random.normal(ks[5], (hd, hd), jnp.float32),
        "wo": scale * jax.random.normal(ks[6], (embed_size, embed_size), jnp.float32),
        "bo": jnp.zeros((1, embed_size), jnp.float32),
        "g1": jnp.ones((1, embed_size), jnp.float32),
        "be1": jnp.zeros((1, embed_size), jnp.float32),
        "w1": scale * jax.random.normal(ks[7], (hidden, embed_size), jnp.float32),
        "b1": 0.01 * jax.random.normal(ks[8], (1, hidden), jnp.float32),
        "w2": scale * jax.random.normal(ks[9], (embed_size, hidden), jnp.float32),
        "b2": 0.01 * jax.random.normal(ks[10], (1, embed_size), jnp.float32),
        "g2": jnp.ones((1, embed_size), jnp.float32),
        "be2": jnp.zeros((1, embed_size), jnp.float32),
    }

    ref = transformer_block_ref(value, keyt, query, mask, params, heads=heads)

    # Exact-math path (f32 MXU operands), q_block=8 exercises the multi-block row loop.
    out_f32 = transformer_block(value, keyt, query, mask, params, heads=heads,
                                compute_dtype=jnp.float32, q_block=8)
    out_f32 = jax.block_until_ready(out_f32)
    assert out_f32.shape == (N, S, embed_size)
    err = float(jnp.max(jnp.abs(out_f32 - ref)))
    assert jnp.allclose(out_f32, ref, atol=2e-3, rtol=2e-3), f"f32 kernel mismatch (max {err})"

    # Fast path (default): bf16 operands + approx softmax reciprocal, f32 accumulation.
    out_fast = transformer_block(value, keyt, query, mask, params, heads=heads)
    out_fast = jax.block_until_ready(out_fast)
    assert out_fast.shape == (N, S, embed_size)
    err = float(jnp.max(jnp.abs(out_fast - ref)))
    assert jnp.allclose(out_fast, ref, atol=5e-2, rtol=5e-2), f"bf16 kernel mismatch (max {err})"

    print("KERNEL_OK")
</pallas_src>

<mosaic_0001>
module attributes {stable_mosaic.version = 11 : i64} {
  func.func @transformer_block_kernel(%arg0: i32, %arg1: memref<1x4x16x24xf32, #tpu.memory_space<vmem>>, %arg2: memref<1x16x32xf32, #tpu.memory_space<vmem>>, %arg3: memref<1x16x16xi8, #tpu.memory_space<vmem>>, %arg4: memref<24x24xf32, #tpu.memory_space<vmem>>, %arg5: memref<4x8x32xf32, #tpu.memory_space<vmem>>, %arg6: memref<1x32xf32, #tpu.memory_space<vmem>>, %arg7: memref<1x32xf32, #tpu.memory_space<vmem>>, %arg8: memref<1x32xf32, #tpu.memory_space<vmem>>, %arg9: memref<32x128xf32, #tpu.memory_space<vmem>>, %arg10: memref<1x128xf32, #tpu.memory_space<vmem>>, %arg11: memref<128x32xf32, #tpu.memory_space<vmem>>, %arg12: memref<1x32xf32, #tpu.memory_space<vmem>>, %arg13: memref<1x32xf32, #tpu.memory_space<vmem>>, %arg14: memref<1x32xf32, #tpu.memory_space<vmem>>, %arg15: memref<1x16x32xf32, #tpu.memory_space<vmem>>, %arg16: memref<4x16x8xf32, #tpu.memory_space<vmem>>, %arg17: memref<1x16x16xf32, #tpu.memory_space<vmem>>) attributes {dimension_semantics = [#tpu.dimension_semantics<parallel>], iteration_bounds = array<i64: 2>, scalar_prefetch = 0 : i64, scratch_operands = 2 : i64, tpu.core_type = #tpu.core_type<tc>, window_params = [{transform_indices = @transform_0, window_bounds = array<i64: 1, 4, 16, 24>}, {transform_indices = @transform_1, window_bounds = array<i64: 1, 16, 32>}, {transform_indices = @transform_2, window_bounds = array<i64: 1, 16, 16>}, {pipeline_mode = #tpu.pipeline_mode<synchronous>, transform_indices = @transform_3, window_bounds = array<i64: 24, 24>}, {pipeline_mode = #tpu.pipeline_mode<synchronous>, transform_indices = @transform_4, window_bounds = array<i64: 4, 8, 32>}, {pipeline_mode = #tpu.pipeline_mode<synchronous>, transform_indices = @transform_5, window_bounds = array<i64: 1, 32>}, {pipeline_mode = #tpu.pipeline_mode<synchronous>, transform_indices = @transform_6, window_bounds = array<i64: 1, 32>}, {pipeline_mode = #tpu.pipeline_mode<synchronous>, transform_indices = @transform_7, window_bounds = array<i64: 1, 32>}, {pipeline_mode = #tpu.pipeline_mode<synchronous>, transform_indices = @transform_8, window_bounds = array<i64: 32, 128>}, {pipeline_mode = #tpu.pipeline_mode<synchronous>, transform_indices = @transform_9, window_bounds = array<i64: 1, 128>}, {pipeline_mode = #tpu.pipeline_mode<synchronous>, transform_indices = @transform_10, window_bounds = array<i64: 128, 32>}, {pipeline_mode = #tpu.pipeline_mode<synchronous>, transform_indices = @transform_11, window_bounds = array<i64: 1, 32>}, {pipeline_mode = #tpu.pipeline_mode<synchronous>, transform_indices = @transform_12, window_bounds = array<i64: 1, 32>}, {pipeline_mode = #tpu.pipeline_mode<synchronous>, transform_indices = @transform_13, window_bounds = array<i64: 1, 32>}, {transform_indices = @transform_14, window_bounds = array<i64: 1, 16, 32>}]} {
    %c0 = arith.constant 0 : index
    %c0_0 = arith.constant 0 : index
    %c0_1 = arith.constant 0 : index
    %c0_2 = arith.constant 0 : index
    %0 = vector.load %arg1[%c0, %c0_0, %c0_1, %c0_2] : memref<1x4x16x24xf32, #tpu.memory_space<vmem>>, vector<1x4x16x24xf32>
    %1 = vector.shape_cast %0 : vector<1x4x16x24xf32> to vector<64x24xf32>
    %c0_3 = arith.constant 0 : index
    %c0_4 = arith.constant 0 : index
    %2 = vector.load %arg4[%c0_3, %c0_4] : memref<24x24xf32, #tpu.memory_space<vmem>>, vector<24x24xf32>
    %cst = arith.constant dense<0.000000e+00> : vector<64x24xf32>
    %3 = tpu.matmul %1, %2, %cst {dimension_numbers = #tpu.dot_dimension_numbers<[1], [0], [0], [1], [0, 0, 1, 1], [], []>} : vector<64x24xf32>, vector<24x24xf32>, vector<64x24xf32> -> vector<64x24xf32>
    %4 = vector.extract_strided_slice %3 {offsets = [0, 0], sizes = [64, 8], strides = [1, 1]} : vector<64x24xf32> to vector<64x8xf32>
    %5 = vector.shape_cast %4 : vector<64x8xf32> to vector<4x16x8xf32>
    %c0_5 = arith.constant 0 : index
    %c0_6 = arith.constant 0 : index
    %c0_7 = arith.constant 0 : index
    %6 = vector.load %arg16[%c0_5, %c0_6, %c0_7] : memref<4x16x8xf32, #tpu.memory_space<vmem>>, vector<4x16x8xf32>
    tpu.vector_store %arg16[%c0_5, %c0_6, %c0_7], %5 {strides = array<i32>} : memref<4x16x8xf32, #tpu.memory_space<vmem>>, vector<4x16x8xf32>,
    %7 = vector.extract_strided_slice %3 {offsets = [0, 8], sizes = [64, 8], strides = [1, 1]} : vector<64x24xf32> to vector<64x8xf32>
    %8 = vector.shape_cast %7 : vector<64x8xf32> to vector<4x16x8xf32>
    %9 = vector.extract_strided_slice %3 {offsets = [0, 16], sizes = [64, 8], strides = [1, 1]} : vector<64x24xf32> to vector<64x8xf32>
    %10 = vector.shape_cast %9 : vector<64x8xf32> to vector<4x16x8xf32>
    %c0_8 = arith.constant 0 : index
    %c0_9 = arith.constant 0 : index
    %c0_10 = arith.constant 0 : index
    %11 = vector.load %arg3[%c0_8, %c0_9, %c0_10] : memref<1x16x16xi8, #tpu.memory_space<vmem>>, vector<1x16x16xi8>
    %12 = arith.extsi %11 : vector<1x16x16xi8> to vector<1x16x16xi32>
    %c0_i32 = arith.constant 0 : i32
    %13 = vector.broadcast %c0_i32 : i32 to vector<1x16x16xi32>
    %14 = arith.cmpi eq, %12, %13 : vector<1x16x16xi32>
    %cst_11 = arith.constant -1.76776698E+19 : f32
    %cst_12 = arith.constant 0.000000e+00 : f32
    %15 = vector.broadcast %cst_11 : f32 to vector<1x16x16xf32>
    %16 = vector.broadcast %cst_12 : f32 to vector<1x16x16xf32>
    %17 = arith.select %14, %15, %16 : vector<1x16x16xi1>, vector<1x16x16xf32>
    %c0_13 = arith.constant 0 : index
    %c0_14 = arith.constant 0 : index
    %c0_15 = arith.constant 0 : index
    %18 = vector.load %arg17[%c0_13, %c0_14, %c0_15] : memref<1x16x16xf32, #tpu.memory_space<vmem>>, vector<1x16x16xf32>
    tpu.vector_store %arg17[%c0_13, %c0_14, %c0_15], %17 {strides = array<i32>} : memref<1x16x16xf32, #tpu.memory_space<vmem>>, vector<1x16x16xf32>,
    %c0_i32_16 = arith.constant 0 : i32
    %c2_i32 = arith.constant 2 : i32
    %19 = arith.addi %c0_i32_16, %c2_i32 : i32
    %c1_i32 = arith.constant 1 : i32
    scf.for %arg18 = %c0_i32_16 to %19 step %c1_i32  : i32 {
      %c8_i32 = arith.constant 8 : i32
      %20 = arith.muli %arg18, %c8_i32 : i32
      %21 = tpu.assume_multiple %20, 8 : i32
      %c0_18 = arith.constant 0 : index
      %22 = arith.index_cast %21 : i32 to index
      %c0_19 = arith.constant 0 : index
      %23 = vector.load %arg16[%c0_18, %22, %c0_19] : memref<4x16x8xf32, #tpu.memory_space<vmem>>, vector<4x8x8xf32>
      "tpu.trace_start"() <{level = 10 : i32, message = "gqd,gkd->gqk"}> : () -> ()
      %cst_20 = arith.constant dense<0.000000e+00> : vector<4x8x16xf32>
      %24 = tpu.matmul %23, %8, %cst_20 {dimension_numbers = #tpu.dot_dimension_numbers<[2], [2], [1], [1], [0, 0, 0, 1, 1, 1], [0], [0]>} : vector<4x8x8xf32>, vector<4x16x8xf32>, vector<4x8x16xf32> -> vector<4x8x16xf32>
      "tpu.trace_stop"() : () -> ()
      %25 = vector.shape_cast %24 : vector<4x8x16xf32> to vector<1x4x8x16xf32>
      %c0_21 = arith.constant 0 : index
      %26 = arith.index_cast %21 : i32 to index
      %c0_22 = arith.constant 0 : index
      %27 = vector.load %arg17[%c0_21, %26, %c0_22] : memref<1x16x16xf32, #tpu.memory_space<vmem>>, vector<1x8x16xf32>
      %28 = vector.shape_cast %27 : vector<1x8x16xf32> to vector<1x1x8x16xf32>
      %29 = vector.broadcast %28 : vector<1x1x8x16xf32> to vector<1x4x8x16xf32>
      %30 = arith.addf %25, %29 : vector<1x4x8x16xf32>
      %31 = vector.shape_cast %30 : vector<1x4x8x16xf32> to vector<4x8x16xf32>
      %cst_23 = arith.constant dense<0xFF800000> : vector<4x8xf32>
      %32 = vector.multi_reduction <maximumf>, %31, %cst_23 [2] : vector<4x8x16xf32> to vector<4x8xf32>
      %33 = vector.shape_cast %32 : vector<4x8xf32> to vector<4x8x1xf32>
      %34 = vector.broadcast %33 : vector<4x8x1xf32> to vector<4x8x16xf32>
      %35 = arith.subf %31, %34 : vector<4x8x16xf32>
      %36 = math.exp %35 : vector<4x8x16xf32>
      %cst_24 = arith.constant dense<0.000000e+00> : vector<4x8xf32>
      %37 = vector.multi_reduction <add>, %36, %cst_24 [2] : vector<4x8x16xf32> to vector<4x8xf32>
      %38 = vector.shape_cast %37 : vector<4x8xf32> to vector<4x8x1xf32>
      %39 = vector.broadcast %38 : vector<4x8x1xf32> to vector<4x8x16xf32>
      %40 = arith.divf %36, %39 : vector<4x8x16xf32>
      "tpu.trace_start"() <{level = 10 : i32, message = "gqk,gkd->gqd"}> : () -> ()
      %cst_25 = arith.constant dense<0.000000e+00> : vector<4x8x8xf32>
      %41 = tpu.matmul %40, %10, %cst_25 {dimension_numbers = #tpu.dot_dimension_numbers<[2], [1], [1], [2], [0, 0, 0, 1, 1, 2], [0], [0]>} : vector<4x8x16xf32>, vector<4x16x8xf32>, vector<4x8x8xf32> -> vector<4x8x8xf32>
      "tpu.trace_stop"() : () -> ()
      %42 = vector.shape_cast %41 : vector<4x8x8xf32> to vector<1x4x8x8xf32>
      %43 = vector.extract_strided_slice %42 {offsets = [0, 0, 0, 0], sizes = [1, 1, 8, 8], strides = [1, 1, 1, 1]} : vector<1x4x8x8xf32> to vector<1x1x8x8xf32>
      %44 = vector.shape_cast %43 : vector<1x1x8x8xf32> to vector<1x8x8xf32>
      %45 = vector.shape_cast %44 : vector<1x8x8xf32> to vector<8x8xf32>
      %c0_26 = arith.constant 0 : index
      %c0_27 = arith.constant 0 : index
      %c0_28 = arith.constant 0 : index
      %46 = vector.load %arg5[%c0_26, %c0_27, %c0_28] : memref<4x8x32xf32, #tpu.memory_space<vmem>>, vector<1x8x32xf32>
      %47 = vector.shape_cast %46 : vector<1x8x32xf32> to vector<8x32xf32>
      %cst_29 = arith.constant dense<0.000000e+00> : vector<8x32xf32>
      %48 = tpu.matmul %45, %47, %cst_29 {dimension_numbers = #tpu.dot_dimension_numbers<[1], [0], [0], [1], [0, 0, 1, 1], [], []>} : vector<8x8xf32>, vector<8x32xf32>, vector<8x32xf32> -> vector<8x32xf32>
      %49 = vector.extract_strided_slice %42 {offsets = [0, 1, 0, 0], sizes = [1, 1, 8, 8], strides = [1, 1, 1, 1]} : vector<1x4x8x8xf32> to vector<1x1x8x8xf32>
      %50 = vector.shape_cast %49 : vector<1x1x8x8xf32> to vector<1x8x8xf32>
      %51 = vector.shape_cast %50 : vector<1x8x8xf32> to vector<8x8xf32>
      %c1 = arith.constant 1 : index
      %c0_30 = arith.constant 0 : index
      %c0_31 = arith.constant 0 : index
      %52 = vector.load %arg5[%c1, %c0_30, %c0_31] : memref<4x8x32xf32, #tpu.memory_space<vmem>>, vector<1x8x32xf32>
      %53 = vector.shape_cast %52 : vector<1x8x32xf32> to vector<8x32xf32>
      %cst_32 = arith.constant dense<0.000000e+00> : vector<8x32xf32>
      %54 = tpu.matmul %51, %53, %cst_32 {dimension_numbers = #tpu.dot_dimension_numbers<[1], [0], [0], [1], [0, 0, 1, 1], [], []>} : vector<8x8xf32>, vector<8x32xf32>, vector<8x32xf32> -> vector<8x32xf32>
      %55 = arith.addf %48, %54 : vector<8x32xf32>
      %56 = vector.extract_strided_slice %42 {offsets = [0, 2, 0, 0], sizes = [1, 1, 8, 8], strides = [1, 1, 1, 1]} : vector<1x4x8x8xf32> to vector<1x1x8x8xf32>
      %57 = vector.shape_cast %56 : vector<1x1x8x8xf32> to vector<1x8x8xf32>
      %58 = vector.shape_cast %57 : vector<1x8x8xf32> to vector<8x8xf32>
      %c2 = arith.constant 2 : index
      %c0_33 = arith.constant 0 : index
      %c0_34 = arith.constant 0 : index
      %59 = vector.load %arg5[%c2, %c0_33, %c0_34] : memref<4x8x32xf32, #tpu.memory_space<vmem>>, vector<1x8x32xf32>
      %60 = vector.shape_cast %59 : vector<1x8x32xf32> to vector<8x32xf32>
      %cst_35 = arith.constant dense<0.000000e+00> : vector<8x32xf32>
      %61 = tpu.matmul %58, %60, %cst_35 {dimension_numbers = #tpu.dot_dimension_numbers<[1], [0], [0], [1], [0, 0, 1, 1], [], []>} : vector<8x8xf32>, vector<8x32xf32>, vector<8x32xf32> -> vector<8x32xf32>
      %62 = arith.addf %55, %61 : vector<8x32xf32>
      %63 = vector.extract_strided_slice %42 {offsets = [0, 3, 0, 0], sizes = [1, 1, 8, 8], strides = [1, 1, 1, 1]} : vector<1x4x8x8xf32> to vector<1x1x8x8xf32>
      %64 = vector.shape_cast %63 : vector<1x1x8x8xf32> to vector<1x8x8xf32>
      %65 = vector.shape_cast %64 : vector<1x8x8xf32> to vector<8x8xf32>
      %c3 = arith.constant 3 : index
      %c0_36 = arith.constant 0 : index
      %c0_37 = arith.constant 0 : index
      %66 = vector.load %arg5[%c3, %c0_36, %c0_37] : memref<4x8x32xf32, #tpu.memory_space<vmem>>, vector<1x8x32xf32>
      %67 = vector.shape_cast %66 : vector<1x8x32xf32> to vector<8x32xf32>
      %cst_38 = arith.constant dense<0.000000e+00> : vector<8x32xf32>
      %68 = tpu.matmul %65, %67, %cst_38 {dimension_numbers = #tpu.dot_dimension_numbers<[1], [0], [0], [1], [0, 0, 1, 1], [], []>} : vector<8x8xf32>, vector<8x32xf32>, vector<8x32xf32> -> vector<8x32xf32>
      %69 = arith.addf %62, %68 : vector<8x32xf32>
      %c0_39 = arith.constant 0 : index
      %c0_40 = arith.constant 0 : index
      %70 = vector.load %arg6[%c0_39, %c0_40] : memref<1x32xf32, #tpu.memory_space<vmem>>, vector<1x32xf32>
      %71 = vector.shape_cast %70 : vector<1x32xf32> to vector<32xf32>
      %72 = vector.shape_cast %71 : vector<32xf32> to vector<1x32xf32>
      %73 = vector.broadcast %72 : vector<1x32xf32> to vector<8x32xf32>
      %74 = arith.addf %69, %73 : vector<8x32xf32>
      %c0_41 = arith.constant 0 : index
      %75 = arith.index_cast %21 : i32 to index
      %c0_42 = arith.constant 0 : index
      %76 = vector.load %arg2[%c0_41, %75, %c0_42] : memref<1x16x32xf32, #tpu.memory_space<vmem>>, vector<1x8x32xf32>
      %77 = vector.shape_cast %76 : vector<1x8x32xf32> to vector<8x32xf32>
      %78 = arith.addf %74, %77 : vector<8x32xf32>
      %cst_43 = arith.constant dense<0.000000e+00> : vector<8xf32>
      %79 = vector.multi_reduction <add>, %78, %cst_43 [1] : vector<8x32xf32> to vector<8xf32>
      %80 = vector.shape_cast %79 : vector<8xf32> to vector<8x1xf32>
      %cst_44 = arith.constant 3.200000e+01 : f32
      %81 = vector.broadcast %cst_44 : f32 to vector<8x1xf32>
      %82 = arith.divf %80, %81 : vector<8x1xf32>
      %83 = vector.broadcast %82 : vector<8x1xf32> to vector<8x32xf32>
      %84 = arith.subf %78, %83 : vector<8x32xf32>
      %85 = arith.mulf %84, %84 : vector<8x32xf32>
      %cst_45 = arith.constant dense<0.000000e+00> : vector<8xf32>
      %86 = vector.multi_reduction <add>, %85, %cst_45 [1] : vector<8x32xf32> to vector<8xf32>
      %87 = vector.shape_cast %86 : vector<8xf32> to vector<8x1xf32>
      %cst_46 = arith.constant 3.200000e+01 : f32
      %88 = vector.broadcast %cst_46 : f32 to vector<8x1xf32>
      %89 = arith.divf %87, %88 : vector<8x1xf32>
      %90 = vector.broadcast %82 : vector<8x1xf32> to vector<8x32xf32>
      %91 = arith.subf %78, %90 : vector<8x32xf32>
      %cst_47 = arith.constant 9.99999974E-6 : f32
      %92 = vector.broadcast %cst_47 : f32 to vector<8x1xf32>
      %93 = arith.addf %89, %92 : vector<8x1xf32>
      %94 = math.rsqrt %93 : vector<8x1xf32>
      %95 = vector.broadcast %94 : vector<8x1xf32> to vector<8x32xf32>
      %96 = arith.mulf %91, %95 : vector<8x32xf32>
      %c0_48 = arith.constant 0 : index
      %c0_49 = arith.constant 0 : index
      %97 = vector.load %arg7[%c0_48, %c0_49] : memref<1x32xf32, #tpu.memory_space<vmem>>, vector<1x32xf32>
      %98 = vector.shape_cast %97 : vector<1x32xf32> to vector<32xf32>
      %99 = vector.shape_cast %98 : vector<32xf32> to vector<1x32xf32>
      %100 = vector.broadcast %99 : vector<1x32xf32> to vector<8x32xf32>
      %101 = arith.mulf %96, %100 : vector<8x32xf32>
      %c0_50 = arith.constant 0 : index
      %c0_51 = arith.constant 0 : index
      %102 = vector.load %arg8[%c0_50, %c0_51] : memref<1x32xf32, #tpu.memory_space<vmem>>, vector<1x32xf32>
      %103 = vector.shape_cast %102 : vector<1x32xf32> to vector<32xf32>
      %104 = vector.shape_cast %103 : vector<32xf32> to vector<1x32xf32>
      %105 = vector.broadcast %104 : vector<1x32xf32> to vector<8x32xf32>
      %106 = arith.addf %101, %105 : vector<8x32xf32>
      %c0_52 = arith.constant 0 : index
      %c0_53 = arith.constant 0 : index
      %107 = vector.load %arg9[%c0_52, %c0_53] : memref<32x128xf32, #tpu.memory_space<vmem>>, vector<32x128xf32>
      %cst_54 = arith.constant dense<0.000000e+00> : vector<8x128xf32>
      %108 = tpu.matmul %106, %107, %cst_54 {dimension_numbers = #tpu.dot_dimension_numbers<[1], [0], [0], [1], [0, 0, 1, 1], [], []>} : vector<8x32xf32>, vector<32x128xf32>, vector<8x128xf32> -> vector<8x128xf32>
      %c0_55 = arith.constant 0 : index
      %c0_56 = arith.constant 0 : index
      %109 = vector.load %arg10[%c0_55, %c0_56] : memref<1x128xf32, #tpu.memory_space<vmem>>, vector<1x128xf32>
      %110 = vector.shape_cast %109 : vector<1x128xf32> to vector<128xf32>
      %111 = vector.shape_cast %110 : vector<128xf32> to vector<1x128xf32>
      %112 = vector.broadcast %111 : vector<1x128xf32> to vector<8x128xf32>
      %113 = arith.addf %108, %112 : vector<8x128xf32>
      %cst_57 = arith.constant 0.000000e+00 : f32
      %114 = vector.broadcast %cst_57 : f32 to vector<8x128xf32>
      %115 = arith.maximumf %113, %114 : vector<8x128xf32>
      %c0_58 = arith.constant 0 : index
      %c0_59 = arith.constant 0 : index
      %116 = vector.load %arg11[%c0_58, %c0_59] : memref<128x32xf32, #tpu.memory_space<vmem>>, vector<128x32xf32>
      %cst_60 = arith.constant dense<0.000000e+00> : vector<8x32xf32>
      %117 = tpu.matmul %115, %116, %cst_60 {dimension_numbers = #tpu.dot_dimension_numbers<[1], [0], [0], [1], [0, 0, 1, 1], [], []>} : vector<8x128xf32>, vector<128x32xf32>, vector<8x32xf32> -> vector<8x32xf32>
      %c0_61 = arith.constant 0 : index
      %c0_62 = arith.constant 0 : index
      %118 = vector.load %arg12[%c0_61, %c0_62] : memref<1x32xf32, #tpu.memory_space<vmem>>, vector<1x32xf32>
      %119 = vector.shape_cast %118 : vector<1x32xf32> to vector<32xf32>
      %120 = vector.shape_cast %119 : vector<32xf32> to vector<1x32xf32>
      %121 = vector.broadcast %120 : vector<1x32xf32> to vector<8x32xf32>
      %122 = arith.addf %117, %121 : vector<8x32xf32>
      %123 = arith.addf %122, %106 : vector<8x32xf32>
      %cst_63 = arith.constant dense<0.000000e+00> : vector<8xf32>
      %124 = vector.multi_reduction <add>, %123, %cst_63 [1] : vector<8x32xf32> to vector<8xf32>
      %125 = vector.shape_cast %124 : vector<8xf32> to vector<8x1xf32>
      %cst_64 = arith.constant 3.200000e+01 : f32
      %126 = vector.broadcast %cst_64 : f32 to vector<8x1xf32>
      %127 = arith.divf %125, %126 : vector<8x1xf32>
      %128 = vector.broadcast %127 : vector<8x1xf32> to vector<8x32xf32>
      %129 = arith.subf %123, %128 : vector<8x32xf32>
      %130 = arith.mulf %129, %129 : vector<8x32xf32>
      %cst_65 = arith.constant dense<0.000000e+00> : vector<8xf32>
      %131 = vector.multi_reduction <add>, %130, %cst_65 [1] : vector<8x32xf32> to vector<8xf32>
      %132 = vector.shape_cast %131 : vector<8xf32> to vector<8x1xf32>
      %cst_66 = arith.constant 3.200000e+01 : f32
      %133 = vector.broadcast %cst_66 : f32 to vector<8x1xf32>
      %134 = arith.divf %132, %133 : vector<8x1xf32>
      %135 = vector.broadcast %127 : vector<8x1xf32> to vector<8x32xf32>
      %136 = arith.subf %123, %135 : vector<8x32xf32>
      %cst_67 = arith.constant 9.99999974E-6 : f32
      %137 = vector.broadcast %cst_67 : f32 to vector<8x1xf32>
      %138 = arith.addf %134, %137 : vector<8x1xf32>
      %139 = math.rsqrt %138 : vector<8x1xf32>
      %140 = vector.broadcast %139 : vector<8x1xf32> to vector<8x32xf32>
      %141 = arith.mulf %136, %140 : vector<8x32xf32>
      %c0_68 = arith.constant 0 : index
      %c0_69 = arith.constant 0 : index
      %142 = vector.load %arg13[%c0_68, %c0_69] : memref<1x32xf32, #tpu.memory_space<vmem>>, vector<1x32xf32>
      %143 = vector.shape_cast %142 : vector<1x32xf32> to vector<32xf32>
      %144 = vector.shape_cast %143 : vector<32xf32> to vector<1x32xf32>
      %145 = vector.broadcast %144 : vector<1x32xf32> to vector<8x32xf32>
      %146 = arith.mulf %141, %145 : vector<8x32xf32>
      %c0_70 = arith.constant 0 : index
      %c0_71 = arith.constant 0 : index
      %147 = vector.load %arg14[%c0_70, %c0_71] : memref<1x32xf32, #tpu.memory_space<vmem>>, vector<1x32xf32>
      %148 = vector.shape_cast %147 : vector<1x32xf32> to vector<32xf32>
      %149 = vector.shape_cast %148 : vector<32xf32> to vector<1x32xf32>
      %150 = vector.broadcast %149 : vector<1x32xf32> to vector<8x32xf32>
      %151 = arith.addf %146, %150 : vector<8x32xf32>
      %152 = vector.shape_cast %151 : vector<8x32xf32> to vector<1x8x32xf32>
      %c0_72 = arith.constant 0 : index
      %153 = arith.index_cast %21 : i32 to index
      %c0_73 = arith.constant 0 : index
      %154 = vector.load %arg15[%c0_72, %153, %c0_73] : memref<1x16x32xf32, #tpu.memory_space<vmem>>, vector<1x8x32xf32>
      tpu.vector_store %arg15[%c0_72, %153, %c0_73], %152 {strides = array<i32>} : memref<1x16x32xf32, #tpu.memory_space<vmem>>, vector<1x8x32xf32>,
    }
    %c2_i32_17 = arith.constant 2 : i32
    return
  }
  func.func @transform_0(%arg0: i32) -> (i32, i32, i32, i32) {
    %c0_i32 = arith.constant 0 : i32
    %c0_i32_0 = arith.constant 0 : i32
    %c0_i32_1 = arith.constant 0 : i32
    %c0_i32_2 = arith.constant 0 : i32
    return %arg0, %c0_i32, %c0_i32_0, %c0_i32_1 : i32, i32, i32, i32
  }
  func.func @transform_1(%arg0: i32) -> (i32, i32, i32) {
    %c0_i32 = arith.constant 0 : i32
    %c0_i32_0 = arith.constant 0 : i32
    %c0_i32_1 = arith.constant 0 : i32
    return %arg0, %c0_i32, %c0_i32_0 : i32, i32, i32
  }
  func.func @transform_2(%arg0: i32) -> (i32, i32, i32) {
    %c0_i32 = arith.constant 0 : i32
    %c0_i32_0 = arith.constant 0 : i32
    %c0_i32_1 = arith.constant 0 : i32
    return %arg0, %c0_i32, %c0_i32_0 : i32, i32, i32
  }
  func.func @transform_3(%arg0: i32) -> (i32, i32) {
    %c0_i32 = arith.constant 0 : i32
    %c0_i32_0 = arith.constant 0 : i32
    %c0_i32_1 = arith.constant 0 : i32
    return %c0_i32, %c0_i32_0 : i32, i32
  }
  func.func @transform_4(%arg0: i32) -> (i32, i32, i32) {
    %c0_i32 = arith.constant 0 : i32
    %c0_i32_0 = arith.constant 0 : i32
    %c0_i32_1 = arith.constant 0 : i32
    %c0_i32_2 = arith.constant 0 : i32
    return %c0_i32, %c0_i32_0, %c0_i32_1 : i32, i32, i32
  }
  func.func @transform_5(%arg0: i32) -> (i32, i32) {
    %c0_i32 = arith.constant 0 : i32
    %c0_i32_0 = arith.constant 0 : i32
    %c0_i32_1 = arith.constant 0 : i32
    return %c0_i32, %c0_i32_0 : i32, i32
  }
  func.func @transform_6(%arg0: i32) -> (i32, i32) {
    %c0_i32 = arith.constant 0 : i32
    %c0_i32_0 = arith.constant 0 : i32
    %c0_i32_1 = arith.constant 0 : i32
    return %c0_i32, %c0_i32_0 : i32, i32
  }
  func.func @transform_7(%arg0: i32) -> (i32, i32) {
    %c0_i32 = arith.constant 0 : i32
    %c0_i32_0 = arith.constant 0 : i32
    %c0_i32_1 = arith.constant 0 : i32
    return %c0_i32, %c0_i32_0 : i32, i32
  }
  func.func @transform_8(%arg0: i32) -> (i32, i32) {
    %c0_i32 = arith.constant 0 : i32
    %c0_i32_0 = arith.constant 0 : i32
    %c0_i32_1 = arith.constant 0 : i32
    return %c0_i32, %c0_i32_0 : i32, i32
  }
  func.func @transform_9(%arg0: i32) -> (i32, i32) {
    %c0_i32 = arith.constant 0 : i32
    %c0_i32_0 = arith.constant 0 : i32
    %c0_i32_1 = arith.constant 0 : i32
    return %c0_i32, %c0_i32_0 : i32, i32
  }
  func.func @transform_10(%arg0: i32) -> (i32, i32) {
    %c0_i32 = arith.constant 0 : i32
    %c0_i32_0 = arith.constant 0 : i32
    %c0_i32_1 = arith.constant 0 : i32
    return %c0_i32, %c0_i32_0 : i32, i32
  }
  func.func @transform_11(%arg0: i32) -> (i32, i32) {
    %c0_i32 = arith.constant 0 : i32
    %c0_i32_0 = arith.constant 0 : i32
    %c0_i32_1 = arith.constant 0 : i32
    return %c0_i32, %c0_i32_0 : i32, i32
  }
  func.func @transform_12(%arg0: i32) -> (i32, i32) {
    %c0_i32 = arith.constant 0 : i32
    %c0_i32_0 = arith.constant 0 : i32
    %c0_i32_1 = arith.constant 0 : i32
    return %c0_i32, %c0_i32_0 : i32, i32
  }
  func.func @transform_13(%arg0: i32) -> (i32, i32) {
    %c0_i32 = arith.constant 0 : i32
    %c0_i32_0 = arith.constant 0 : i32
    %c0_i32_1 = arith.constant 0 : i32
    return %c0_i32, %c0_i32_0 : i32, i32
  }
  func.func @transform_14(%arg0: i32) -> (i32, i32, i32) {
    %c0_i32 = arith.constant 0 : i32
    %c0_i32_0 = arith.constant 0 : i32
    %c0_i32_1 = arith.constant 0 : i32
    return %arg0, %c0_i32, %c0_i32_0 : i32, i32, i32
  }
}

module attributes {stable_mosaic.version = 11 : i64} {
  func.func @transformer_block_kernel(%arg0: i32, %arg1: memref<1x4x16x24xf32, #tpu.memory_space<vmem>>, %arg2: memref<1x16x32xf32, #tpu.memory_space<vmem>>, %arg3: memref<1x16x16xi8, #tpu.memory_space<vmem>>, %arg4: memref<24x24xf32, #tpu.memory_space<vmem>>, %arg5: memref<4x8x32xf32, #tpu.memory_space<vmem>>, %arg6: memref<1x32xf32, #tpu.memory_space<vmem>>, %arg7: memref<1x32xf32, #tpu.memory_space<vmem>>, %arg8: memref<1x32xf32, #tpu.memory_space<vmem>>, %arg9: memref<32x128xf32, #tpu.memory_space<vmem>>, %arg10: memref<1x128xf32, #tpu.memory_space<vmem>>, %arg11: memref<128x32xf32, #tpu.memory_space<vmem>>, %arg12: memref<1x32xf32, #tpu.memory_space<vmem>>, %arg13: memref<1x32xf32, #tpu.memory_space<vmem>>, %arg14: memref<1x32xf32, #tpu.memory_space<vmem>>, %arg15: memref<1x16x32xf32, #tpu.memory_space<vmem>>, %arg16: memref<4x16x8xf32, #tpu.memory_space<vmem>>, %arg17: memref<1x16x16xf32, #tpu.memory_space<vmem>>) attributes {dimension_semantics = [#tpu.dimension_semantics<parallel>], iteration_bounds = array<i64: 2>, scalar_prefetch = 0 : i64, scratch_operands = 2 : i64, tpu.core_type = #tpu.core_type<tc>, window_params = [{transform_indices = @transform_0, window_bounds = array<i64: 1, 4, 16, 24>}, {transform_indices = @transform_1, window_bounds = array<i64: 1, 16, 32>}, {transform_indices = @transform_2, window_bounds = array<i64: 1, 16, 16>}, {pipeline_mode = #tpu.pipeline_mode<synchronous>, transform_indices = @transform_3, window_bounds = array<i64: 24, 24>}, {pipeline_mode = #tpu.pipeline_mode<synchronous>, transform_indices = @transform_4, window_bounds = array<i64: 4, 8, 32>}, {pipeline_mode = #tpu.pipeline_mode<synchronous>, transform_indices = @transform_5, window_bounds = array<i64: 1, 32>}, {pipeline_mode = #tpu.pipeline_mode<synchronous>, transform_indices = @transform_6, window_bounds = array<i64: 1, 32>}, {pipeline_mode = #tpu.pipeline_mode<synchronous>, transform_indices = @transform_7, window_bounds = array<i64: 1, 32>}, {pipeline_mode = #tpu.pipeline_mode<synchronous>, transform_indices = @transform_8, window_bounds = array<i64: 32, 128>}, {pipeline_mode = #tpu.pipeline_mode<synchronous>, transform_indices = @transform_9, window_bounds = array<i64: 1, 128>}, {pipeline_mode = #tpu.pipeline_mode<synchronous>, transform_indices = @transform_10, window_bounds = array<i64: 128, 32>}, {pipeline_mode = #tpu.pipeline_mode<synchronous>, transform_indices = @transform_11, window_bounds = array<i64: 1, 32>}, {pipeline_mode = #tpu.pipeline_mode<synchronous>, transform_indices = @transform_12, window_bounds = array<i64: 1, 32>}, {pipeline_mode = #tpu.pipeline_mode<synchronous>, transform_indices = @transform_13, window_bounds = array<i64: 1, 32>}, {transform_indices = @transform_14, window_bounds = array<i64: 1, 16, 32>}]} {
    %c0 = arith.constant 0 : index
    %c0_0 = arith.constant 0 : index
    %c0_1 = arith.constant 0 : index
    %c0_2 = arith.constant 0 : index
    %0 = vector.load %arg1[%c0, %c0_0, %c0_1, %c0_2] : memref<1x4x16x24xf32, #tpu.memory_space<vmem>>, vector<1x4x16x24xf32>
    %1 = vector.shape_cast %0 : vector<1x4x16x24xf32> to vector<64x24xf32>
    %c0_3 = arith.constant 0 : index
    %c0_4 = arith.constant 0 : index
    %2 = vector.load %arg4[%c0_3, %c0_4] : memref<24x24xf32, #tpu.memory_space<vmem>>, vector<24x24xf32>
    %cst = arith.constant dense<0.000000e+00> : vector<64x24xf32>
    %3 = tpu.matmul %1, %2, %cst {dimension_numbers = #tpu.dot_dimension_numbers<[1], [0], [0], [1], [0, 0, 1, 1], [], []>} : vector<64x24xf32>, vector<24x24xf32>, vector<64x24xf32> -> vector<64x24xf32>
    %4 = vector.extract_strided_slice %3 {offsets = [0, 0], sizes = [64, 8], strides = [1, 1]} : vector<64x24xf32> to vector<64x8xf32>
    %5 = vector.shape_cast %4 : vector<64x8xf32> to vector<4x16x8xf32>
    %c0_5 = arith.constant 0 : index
    %c0_6 = arith.constant 0 : index
    %c0_7 = arith.constant 0 : index
    %6 = vector.load %arg16[%c0_5, %c0_6, %c0_7] : memref<4x16x8xf32, #tpu.memory_space<vmem>>, vector<4x16x8xf32>
    tpu.vector_store %arg16[%c0_5, %c0_6, %c0_7], %5 {strides = array<i32>} : memref<4x16x8xf32, #tpu.memory_space<vmem>>, vector<4x16x8xf32>,
    %7 = vector.extract_strided_slice %3 {offsets = [0, 8], sizes = [64, 8], strides = [1, 1]} : vector<64x24xf32> to vector<64x8xf32>
    %8 = vector.shape_cast %7 : vector<64x8xf32> to vector<4x16x8xf32>
    %9 = vector.extract_strided_slice %3 {offsets = [0, 16], sizes = [64, 8], strides = [1, 1]} : vector<64x24xf32> to vector<64x8xf32>
    %10 = vector.shape_cast %9 : vector<64x8xf32> to vector<4x16x8xf32>
    %c0_8 = arith.constant 0 : index
    %c0_9 = arith.constant 0 : index
    %c0_10 = arith.constant 0 : index
    %11 = vector.load %arg3[%c0_8, %c0_9, %c0_10] : memref<1x16x16xi8, #tpu.memory_space<vmem>>, vector<1x16x16xi8>
    %12 = arith.extsi %11 : vector<1x16x16xi8> to vector<1x16x16xi32>
    %c0_i32 = arith.constant 0 : i32
    %13 = vector.broadcast %c0_i32 : i32 to vector<1x16x16xi32>
    %14 = arith.cmpi eq, %12, %13 : vector<1x16x16xi32>
    %cst_11 = arith.constant -1.76776698E+19 : f32
    %cst_12 = arith.constant 0.000000e+00 : f32
    %15 = vector.broadcast %cst_11 : f32 to vector<1x16x16xf32>
    %16 = vector.broadcast %cst_12 : f32 to vector<1x16x16xf32>
    %17 = arith.select %14, %15, %16 : vector<1x16x16xi1>, vector<1x16x16xf32>
    %c0_13 = arith.constant 0 : index
    %c0_14 = arith.constant 0 : index
    %c0_15 = arith.constant 0 : index
    %18 = vector.load %arg17[%c0_13, %c0_14, %c0_15] : memref<1x16x16xf32, #tpu.memory_space<vmem>>, vector<1x16x16xf32>
    tpu.vector_store %arg17[%c0_13, %c0_14, %c0_15], %17 {strides = array<i32>} : memref<1x16x16xf32, #tpu.memory_space<vmem>>, vector<1x16x16xf32>,
    %c0_i32_16 = arith.constant 0 : i32
    %c2_i32 = arith.constant 2 : i32
    %19 = arith.addi %c0_i32_16, %c2_i32 : i32
    %c1_i32 = arith.constant 1 : i32
    scf.for %arg18 = %c0_i32_16 to %19 step %c1_i32  : i32 {
      %c8_i32 = arith.constant 8 : i32
      %20 = arith.muli %arg18, %c8_i32 : i32
      %21 = tpu.assume_multiple %20, 8 : i32
      %c0_18 = arith.constant 0 : index
      %22 = arith.index_cast %21 : i32 to index
      %c0_19 = arith.constant 0 : index
      %23 = vector.load %arg16[%c0_18, %22, %c0_19] : memref<4x16x8xf32, #tpu.memory_space<vmem>>, vector<4x8x8xf32>
      "tpu.trace_start"() <{level = 10 : i32, message = "gqd,gkd->gqk"}> : () -> ()
      %cst_20 = arith.constant dense<0.000000e+00> : vector<4x8x16xf32>
      %24 = tpu.matmul %23, %8, %cst_20 {dimension_numbers = #tpu.dot_dimension_numbers<[2], [2], [1], [1], [0, 0, 0, 1, 1, 1], [0], [0]>} : vector<4x8x8xf32>, vector<4x16x8xf32>, vector<4x8x16xf32> -> vector<4x8x16xf32>
      "tpu.trace_stop"() : () -> ()
      %25 = vector.shape_cast %24 : vector<4x8x16xf32> to vector<1x4x8x16xf32>
      %c0_21 = arith.constant 0 : index
      %26 = arith.index_cast %21 : i32 to index
      %c0_22 = arith.constant 0 : index
      %27 = vector.load %arg17[%c0_21, %26, %c0_22] : memref<1x16x16xf32, #tpu.memory_space<vmem>>, vector<1x8x16xf32>
      %28 = vector.shape_cast %27 : vector<1x8x16xf32> to vector<1x1x8x16xf32>
      %29 = vector.broadcast %28 : vector<1x1x8x16xf32> to vector<1x4x8x16xf32>
      %30 = arith.addf %25, %29 : vector<1x4x8x16xf32>
      %31 = vector.shape_cast %30 : vector<1x4x8x16xf32> to vector<4x8x16xf32>
      %cst_23 = arith.constant dense<0xFF800000> : vector<4x8xf32>
      %32 = vector.multi_reduction <maximumf>, %31, %cst_23 [2] : vector<4x8x16xf32> to vector<4x8xf32>
      %33 = vector.shape_cast %32 : vector<4x8xf32> to vector<4x8x1xf32>
      %34 = vector.broadcast %33 : vector<4x8x1xf32> to vector<4x8x16xf32>
      %35 = arith.subf %31, %34 : vector<4x8x16xf32>
      %36 = math.exp %35 : vector<4x8x16xf32>
      %cst_24 = arith.constant dense<0.000000e+00> : vector<4x8xf32>
      %37 = vector.multi_reduction <add>, %36, %cst_24 [2] : vector<4x8x16xf32> to vector<4x8xf32>
      %38 = vector.shape_cast %37 : vector<4x8xf32> to vector<4x8x1xf32>
      %39 = vector.broadcast %38 : vector<4x8x1xf32> to vector<4x8x16xf32>
      %40 = arith.divf %36, %39 : vector<4x8x16xf32>
      "tpu.trace_start"() <{level = 10 : i32, message = "gqk,gkd->gqd"}> : () -> ()
      %cst_25 = arith.constant dense<0.000000e+00> : vector<4x8x8xf32>
      %41 = tpu.matmul %40, %10, %cst_25 {dimension_numbers = #tpu.dot_dimension_numbers<[2], [1], [1], [2], [0, 0, 0, 1, 1, 2], [0], [0]>} : vector<4x8x16xf32>, vector<4x16x8xf32>, vector<4x8x8xf32> -> vector<4x8x8xf32>
      "tpu.trace_stop"() : () -> ()
      %42 = vector.shape_cast %41 : vector<4x8x8xf32> to vector<1x4x8x8xf32>
      %43 = vector.extract_strided_slice %42 {offsets = [0, 0, 0, 0], sizes = [1, 1, 8, 8], strides = [1, 1, 1, 1]} : vector<1x4x8x8xf32> to vector<1x1x8x8xf32>
      %44 = vector.shape_cast %43 : vector<1x1x8x8xf32> to vector<1x8x8xf32>
      %45 = vector.shape_cast %44 : vector<1x8x8xf32> to vector<8x8xf32>
      %c0_26 = arith.constant 0 : index
      %c0_27 = arith.constant 0 : index
      %c0_28 = arith.constant 0 : index
      %46 = vector.load %arg5[%c0_26, %c0_27, %c0_28] : memref<4x8x32xf32, #tpu.memory_space<vmem>>, vector<1x8x32xf32>
      %47 = vector.shape_cast %46 : vector<1x8x32xf32> to vector<8x32xf32>
      %cst_29 = arith.constant dense<0.000000e+00> : vector<8x32xf32>
      %48 = tpu.matmul %45, %47, %cst_29 {dimension_numbers = #tpu.dot_dimension_numbers<[1], [0], [0], [1], [0, 0, 1, 1], [], []>} : vector<8x8xf32>, vector<8x32xf32>, vector<8x32xf32> -> vector<8x32xf32>
      %49 = vector.extract_strided_slice %42 {offsets = [0, 1, 0, 0], sizes = [1, 1, 8, 8], strides = [1, 1, 1, 1]} : vector<1x4x8x8xf32> to vector<1x1x8x8xf32>
      %50 = vector.shape_cast %49 : vector<1x1x8x8xf32> to vector<1x8x8xf32>
      %51 = vector.shape_cast %50 : vector<1x8x8xf32> to vector<8x8xf32>
      %c1 = arith.constant 1 : index
      %c0_30 = arith.constant 0 : index
      %c0_31 = arith.constant 0 : index
      %52 = vector.load %arg5[%c1, %c0_30, %c0_31] : memref<4x8x32xf32, #tpu.memory_space<vmem>>, vector<1x8x32xf32>
      %53 = vector.shape_cast %52 : vector<1x8x32xf32> to vector<8x32xf32>
      %cst_32 = arith.constant dense<0.000000e+00> : vector<8x32xf32>
      %54 = tpu.matmul %51, %53, %cst_32 {dimension_numbers = #tpu.dot_dimension_numbers<[1], [0], [0], [1], [0, 0, 1, 1], [], []>} : vector<8x8xf32>, vector<8x32xf32>, vector<8x32xf32> -> vector<8x32xf32>
      %55 = arith.addf %48, %54 : vector<8x32xf32>
      %56 = vector.extract_strided_slice %42 {offsets = [0, 2, 0, 0], sizes = [1, 1, 8, 8], strides = [1, 1, 1, 1]} : vector<1x4x8x8xf32> to vector<1x1x8x8xf32>
      %57 = vector.shape_cast %56 : vector<1x1x8x8xf32> to vector<1x8x8xf32>
      %58 = vector.shape_cast %57 : vector<1x8x8xf32> to vector<8x8xf32>
      %c2 = arith.constant 2 : index
      %c0_33 = arith.constant 0 : index
      %c0_34 = arith.constant 0 : index
      %59 = vector.load %arg5[%c2, %c0_33, %c0_34] : memref<4x8x32xf32, #tpu.memory_space<vmem>>, vector<1x8x32xf32>
      %60 = vector.shape_cast %59 : vector<1x8x32xf32> to vector<8x32xf32>
      %cst_35 = arith.constant dense<0.000000e+00> : vector<8x32xf32>
      %61 = tpu.matmul %58, %60, %cst_35 {dimension_numbers = #tpu.dot_dimension_numbers<[1], [0], [0], [1], [0, 0, 1, 1], [], []>} : vector<8x8xf32>, vector<8x32xf32>, vector<8x32xf32> -> vector<8x32xf32>
      %62 = arith.addf %55, %61 : vector<8x32xf32>
      %63 = vector.extract_strided_slice %42 {offsets = [0, 3, 0, 0], sizes = [1, 1, 8, 8], strides = [1, 1, 1, 1]} : vector<1x4x8x8xf32> to vector<1x1x8x8xf32>
      %64 = vector.shape_cast %63 : vector<1x1x8x8xf32> to vector<1x8x8xf32>
      %65 = vector.shape_cast %64 : vector<1x8x8xf32> to vector<8x8xf32>
      %c3 = arith.constant 3 : index
      %c0_36 = arith.constant 0 : index
      %c0_37 = arith.constant 0 : index
      %66 = vector.load %arg5[%c3, %c0_36, %c0_37] : memref<4x8x32xf32, #tpu.memory_space<vmem>>, vector<1x8x32xf32>
      %67 = vector.shape_cast %66 : vector<1x8x32xf32> to vector<8x32xf32>
      %cst_38 = arith.constant dense<0.000000e+00> : vector<8x32xf32>
      %68 = tpu.matmul %65, %67, %cst_38 {dimension_numbers = #tpu.dot_dimension_numbers<[1], [0], [0], [1], [0, 0, 1, 1], [], []>} : vector<8x8xf32>, vector<8x32xf32>, vector<8x32xf32> -> vector<8x32xf32>
      %69 = arith.addf %62, %68 : vector<8x32xf32>
      %c0_39 = arith.constant 0 : index
      %c0_40 = arith.constant 0 : index
      %70 = vector.load %arg6[%c0_39, %c0_40] : memref<1x32xf32, #tpu.memory_space<vmem>>, vector<1x32xf32>
      %71 = vector.shape_cast %70 : vector<1x32xf32> to vector<32xf32>
      %72 = vector.shape_cast %71 : vector<32xf32> to vector<1x32xf32>
      %73 = vector.broadcast %72 : vector<1x32xf32> to vector<8x32xf32>
      %74 = arith.addf %69, %73 : vector<8x32xf32>
      %c0_41 = arith.constant 0 : index
      %75 = arith.index_cast %21 : i32 to index
      %c0_42 = arith.constant 0 : index
      %76 = vector.load %arg2[%c0_41, %75, %c0_42] : memref<1x16x32xf32, #tpu.memory_space<vmem>>, vector<1x8x32xf32>
      %77 = vector.shape_cast %76 : vector<1x8x32xf32> to vector<8x32xf32>
      %78 = arith.addf %74, %77 : vector<8x32xf32>
      %cst_43 = arith.constant dense<0.000000e+00> : vector<8xf32>
      %79 = vector.multi_reduction <add>, %78, %cst_43 [1] : vector<8x32xf32> to vector<8xf32>
      %80 = vector.shape_cast %79 : vector<8xf32> to vector<8x1xf32>
      %cst_44 = arith.constant 3.200000e+01 : f32
      %81 = vector.broadcast %cst_44 : f32 to vector<8x1xf32>
      %82 = arith.divf %80, %81 : vector<8x1xf32>
      %83 = vector.broadcast %82 : vector<8x1xf32> to vector<8x32xf32>
      %84 = arith.subf %78, %83 : vector<8x32xf32>
      %85 = arith.mulf %84, %84 : vector<8x32xf32>
      %cst_45 = arith.constant dense<0.000000e+00> : vector<8xf32>
      %86 = vector.multi_reduction <add>, %85, %cst_45 [1] : vector<8x32xf32> to vector<8xf32>
      %87 = vector.shape_cast %86 : vector<8xf32> to vector<8x1xf32>
      %cst_46 = arith.constant 3.200000e+01 : f32
      %88 = vector.broadcast %cst_46 : f32 to vector<8x1xf32>
      %89 = arith.divf %87, %88 : vector<8x1xf32>
      %90 = vector.broadcast %82 : vector<8x1xf32> to vector<8x32xf32>
      %91 = arith.subf %78, %90 : vector<8x32xf32>
      %cst_47 = arith.constant 9.99999974E-6 : f32
      %92 = vector.broadcast %cst_47 : f32 to vector<8x1xf32>
      %93 = arith.addf %89, %92 : vector<8x1xf32>
      %94 = math.rsqrt %93 : vector<8x1xf32>
      %95 = vector.broadcast %94 : vector<8x1xf32> to vector<8x32xf32>
      %96 = arith.mulf %91, %95 : vector<8x32xf32>
      %c0_48 = arith.constant 0 : index
      %c0_49 = arith.constant 0 : index
      %97 = vector.load %arg7[%c0_48, %c0_49] : memref<1x32xf32, #tpu.memory_space<vmem>>, vector<1x32xf32>
      %98 = vector.shape_cast %97 : vector<1x32xf32> to vector<32xf32>
      %99 = vector.shape_cast %98 : vector<32xf32> to vector<1x32xf32>
      %100 = vector.broadcast %99 : vector<1x32xf32> to vector<8x32xf32>
      %101 = arith.mulf %96, %100 : vector<8x32xf32>
      %c0_50 = arith.constant 0 : index
      %c0_51 = arith.constant 0 : index
      %102 = vector.load %arg8[%c0_50, %c0_51] : memref<1x32xf32, #tpu.memory_space<vmem>>, vector<1x32xf32>
      %103 = vector.shape_cast %102 : vector<1x32xf32> to vector<32xf32>
      %104 = vector.shape_cast %103 : vector<32xf32> to vector<1x32xf32>
      %105 = vector.broadcast %104 : vector<1x32xf32> to vector<8x32xf32>
      %106 = arith.addf %101, %105 : vector<8x32xf32>
      %c0_52 = arith.constant 0 : index
      %c0_53 = arith.constant 0 : index
      %107 = vector.load %arg9[%c0_52, %c0_53] : memref<32x128xf32, #tpu.memory_space<vmem>>, vector<32x128xf32>
      %cst_54 = arith.constant dense<0.000000e+00> : vector<8x128xf32>
      %108 = tpu.matmul %106, %107, %cst_54 {dimension_numbers = #tpu.dot_dimension_numbers<[1], [0], [0], [1], [0, 0, 1, 1], [], []>} : vector<8x32xf32>, vector<32x128xf32>, vector<8x128xf32> -> vector<8x128xf32>
      %c0_55 = arith.constant 0 : index
      %c0_56 = arith.constant 0 : index
      %109 = vector.load %arg10[%c0_55, %c0_56] : memref<1x128xf32, #tpu.memory_space<vmem>>, vector<1x128xf32>
      %110 = vector.shape_cast %109 : vector<1x128xf32> to vector<128xf32>
      %111 = vector.shape_cast %110 : vector<128xf32> to vector<1x128xf32>
      %112 = vector.broadcast %111 : vector<1x128xf32> to vector<8x128xf32>
      %113 = arith.addf %108, %112 : vector<8x128xf32>
      %cst_57 = arith.constant 0.000000e+00 : f32
      %114 = vector.broadcast %cst_57 : f32 to vector<8x128xf32>
      %115 = arith.maximumf %113, %114 : vector<8x128xf32>
      %c0_58 = arith.constant 0 : index
      %c0_59 = arith.constant 0 : index
      %116 = vector.load %arg11[%c0_58, %c0_59] : memref<128x32xf32, #tpu.memory_space<vmem>>, vector<128x32xf32>
      %cst_60 = arith.constant dense<0.000000e+00> : vector<8x32xf32>
      %117 = tpu.matmul %115, %116, %cst_60 {dimension_numbers = #tpu.dot_dimension_numbers<[1], [0], [0], [1], [0, 0, 1, 1], [], []>} : vector<8x128xf32>, vector<128x32xf32>, vector<8x32xf32> -> vector<8x32xf32>
      %c0_61 = arith.constant 0 : index
      %c0_62 = arith.constant 0 : index
      %118 = vector.load %arg12[%c0_61, %c0_62] : memref<1x32xf32, #tpu.memory_space<vmem>>, vector<1x32xf32>
      %119 = vector.shape_cast %118 : vector<1x32xf32> to vector<32xf32>
      %120 = vector.shape_cast %119 : vector<32xf32> to vector<1x32xf32>
      %121 = vector.broadcast %120 : vector<1x32xf32> to vector<8x32xf32>
      %122 = arith.addf %117, %121 : vector<8x32xf32>
      %123 = arith.addf %122, %106 : vector<8x32xf32>
      %cst_63 = arith.constant dense<0.000000e+00> : vector<8xf32>
      %124 = vector.multi_reduction <add>, %123, %cst_63 [1] : vector<8x32xf32> to vector<8xf32>
      %125 = vector.shape_cast %124 : vector<8xf32> to vector<8x1xf32>
      %cst_64 = arith.constant 3.200000e+01 : f32
      %126 = vector.broadcast %cst_64 : f32 to vector<8x1xf32>
      %127 = arith.divf %125, %126 : vector<8x1xf32>
      %128 = vector.broadcast %127 : vector<8x1xf32> to vector<8x32xf32>
      %129 = arith.subf %123, %128 : vector<8x32xf32>
      %130 = arith.mulf %129, %129 : vector<8x32xf32>
      %cst_65 = arith.constant dense<0.000000e+00> : vector<8xf32>
      %131 = vector.multi_reduction <add>, %130, %cst_65 [1] : vector<8x32xf32> to vector<8xf32>
      %132 = vector.shape_cast %131 : vector<8xf32> to vector<8x1xf32>
      %cst_66 = arith.constant 3.200000e+01 : f32
      %133 = vector.broadcast %cst_66 : f32 to vector<8x1xf32>
      %134 = arith.divf %132, %133 : vector<8x1xf32>
      %135 = vector.broadcast %127 : vector<8x1xf32> to vector<8x32xf32>
      %136 = arith.subf %123, %135 : vector<8x32xf32>
      %cst_67 = arith.constant 9.99999974E-6 : f32
      %137 = vector.broadcast %cst_67 : f32 to vector<8x1xf32>
      %138 = arith.addf %134, %137 : vector<8x1xf32>
      %139 = math.rsqrt %138 : vector<8x1xf32>
      %140 = vector.broadcast %139 : vector<8x1xf32> to vector<8x32xf32>
      %141 = arith.mulf %136, %140 : vector<8x32xf32>
      %c0_68 = arith.constant 0 : index
      %c0_69 = arith.constant 0 : index
      %142 = vector.load %arg13[%c0_68, %c0_69] : memref<1x32xf32, #tpu.memory_space<vmem>>, vector<1x32xf32>
      %143 = vector.shape_cast %142 : vector<1x32xf32> to vector<32xf32>
      %144 = vector.shape_cast %143 : vector<32xf32> to vector<1x32xf32>
      %145 = vector.broadcast %144 : vector<1x32xf32> to vector<8x32xf32>
      %146 = arith.mulf %141, %145 : vector<8x32xf32>
      %c0_70 = arith.constant 0 : index
      %c0_71 = arith.constant 0 : index
      %147 = vector.load %arg14[%c0_70, %c0_71] : memref<1x32xf32, #tpu.memory_space<vmem>>, vector<1x32xf32>
      %148 = vector.shape_cast %147 : vector<1x32xf32> to vector<32xf32>
      %149 = vector.shape_cast %148 : vector<32xf32> to vector<1x32xf32>
      %150 = vector.broadcast %149 : vector<1x32xf32> to vector<8x32xf32>
      %151 = arith.addf %146, %150 : vector<8x32xf32>
      %152 = vector.shape_cast %151 : vector<8x32xf32> to vector<1x8x32xf32>
      %c0_72 = arith.constant 0 : index
      %153 = arith.index_cast %21 : i32 to index
      %c0_73 = arith.constant 0 : index
      %154 = vector.load %arg15[%c0_72, %153, %c0_73] : memref<1x16x32xf32, #tpu.memory_space<vmem>>, vector<1x8x32xf32>
      tpu.vector_store %arg15[%c0_72, %153, %c0_73], %152 {strides = array<i32>} : memref<1x16x32xf32, #tpu.memory_space<vmem>>, vector<1x8x32xf32>,
    }
    %c2_i32_17 = arith.constant 2 : i32
    return
  }
  func.func @transform_0(%arg0: i32) -> (i32, i32, i32, i32) {
    %c0_i32 = arith.constant 0 : i32
    %c0_i32_0 = arith.constant 0 : i32
    %c0_i32_1 = arith.constant 0 : i32
    %c0_i32_2 = arith.constant 0 : i32
    return %arg0, %c0_i32, %c0_i32_0, %c0_i32_1 : i32, i32, i32, i32
  }
  func.func @transform_1(%arg0: i32) -> (i32, i32, i32) {
    %c0_i32 = arith.constant 0 : i32
    %c0_i32_0 = arith.constant 0 : i32
    %c0_i32_1 = arith.constant 0 : i32
    return %arg0, %c0_i32, %c0_i32_0 : i32, i32, i32
  }
  func.func @transform_2(%arg0: i32) -> (i32, i32, i32) {
    %c0_i32 = arith.constant 0 : i32
    %c0_i32_0 = arith.constant 0 : i32
    %c0_i32_1 = arith.constant 0 : i32
    return %arg0, %c0_i32, %c0_i32_0 : i32, i32, i32
  }
  func.func @transform_3(%arg0: i32) -> (i32, i32) {
    %c0_i32 = arith.constant 0 : i32
    %c0_i32_0 = arith.constant 0 : i32
    %c0_i32_1 = arith.constant 0 : i32
    return %c0_i32, %c0_i32_0 : i32, i32
  }
  func.func @transform_4(%arg0: i32) -> (i32, i32, i32) {
    %c0_i32 = arith.constant 0 : i32
    %c0_i32_0 = arith.constant 0 : i32
    %c0_i32_1 = arith.constant 0 : i32
    %c0_i32_2 = arith.constant 0 : i32
    return %c0_i32, %c0_i32_0, %c0_i32_1 : i32, i32, i32
  }
  func.func @transform_5(%arg0: i32) -> (i32, i32) {
    %c0_i32 = arith.constant 0 : i32
    %c0_i32_0 = arith.constant 0 : i32
    %c0_i32_1 = arith.constant 0 : i32
    return %c0_i32, %c0_i32_0 : i32, i32
  }
  func.func @transform_6(%arg0: i32) -> (i32, i32) {
    %c0_i32 = arith.constant 0 : i32
    %c0_i32_0 = arith.constant 0 : i32
    %c0_i32_1 = arith.constant 0 : i32
    return %c0_i32, %c0_i32_0 : i32, i32
  }
  func.func @transform_7(%arg0: i32) -> (i32, i32) {
    %c0_i32 = arith.constant 0 : i32
    %c0_i32_0 = arith.constant 0 : i32
    %c0_i32_1 = arith.constant 0 : i32
    return %c0_i32, %c0_i32_0 : i32, i32
  }
  func.func @transform_8(%arg0: i32) -> (i32, i32) {
    %c0_i32 = arith.constant 0 : i32
    %c0_i32_0 = arith.constant 0 : i32
    %c0_i32_1 = arith.constant 0 : i32
    return %c0_i32, %c0_i32_0 : i32, i32
  }
  func.func @transform_9(%arg0: i32) -> (i32, i32) {
    %c0_i32 = arith.constant 0 : i32
    %c0_i32_0 = arith.constant 0 : i32
    %c0_i32_1 = arith.constant 0 : i32
    return %c0_i32, %c0_i32_0 : i32, i32
  }
  func.func @transform_10(%arg0: i32) -> (i32, i32) {
    %c0_i32 = arith.constant 0 : i32
    %c0_i32_0 = arith.constant 0 : i32
    %c0_i32_1 = arith.constant 0 : i32
    return %c0_i32, %c0_i32_0 : i32, i32
  }
  func.func @transform_11(%arg0: i32) -> (i32, i32) {
    %c0_i32 = arith.constant 0 : i32
    %c0_i32_0 = arith.constant 0 : i32
    %c0_i32_1 = arith.constant 0 : i32
    return %c0_i32, %c0_i32_0 : i32, i32
  }
  func.func @transform_12(%arg0: i32) -> (i32, i32) {
    %c0_i32 = arith.constant 0 : i32
    %c0_i32_0 = arith.constant 0 : i32
    %c0_i32_1 = arith.constant 0 : i32
    return %c0_i32, %c0_i32_0 : i32, i32
  }
  func.func @transform_13(%arg0: i32) -> (i32, i32) {
    %c0_i32 = arith.constant 0 : i32
    %c0_i32_0 = arith.constant 0 : i32
    %c0_i32_1 = arith.constant 0 : i32
    return %c0_i32, %c0_i32_0 : i32, i32
  }
  func.func @transform_14(%arg0: i32) -> (i32, i32, i32) {
    %c0_i32 = arith.constant 0 : i32
    %c0_i32_0 = arith.constant 0 : i32
    %c0_i32_1 = arith.constant 0 : i32
    return %arg0, %c0_i32, %c0_i32_0 : i32, i32, i32
  }
}

</mosaic_0001>

<bundles_post_ra>
// kernel: tpu_custom_call.1
= control target key start
LH: loop header
LB: loop body
LE: loop exit
PB: predicated region body
PF: predicated region fallthrough
CT: control target
= control target key end

     0   :  { %s3302_s0 = inlined_call_operand.vmem [shape: f32[2,4,16,24], index: 0, kind: input, shape index: {}]   ;;  %s3303_s1 = inlined_call_operand.vmem [shape: f32[2,16,32], index: 1, kind: input, shape index: {}]   ;;  %s3304_s2 = inlined_call_operand.hbm [shape: s8[2,16,16], index: 2, kind: input, shape index: {}]   ;;  %s3305_s3 = inlined_call_operand.hbm [shape: f32[24,24], index: 3, kind: input, shape index: {}]   ;;  %s3306_s4 = inlined_call_operand.hbm [shape: f32[4,8,32], index: 4, kind: input, shape index: {}]   ;;  %s3307_s5 = inlined_call_operand.vmem [shape: f32[1,32], index: 5, kind: input, shape index: {}]   ;;  %s3308_s6 = inlined_call_operand.vmem [shape: f32[1,32], index: 6, kind: input, shape index: {}]   ;;  %s3309_s7 = inlined_call_operand.vmem [shape: f32[1,32], index: 7, kind: input, shape index: {}]   ;;  %s3310_s8 = inlined_call_operand.hbm [shape: f32[32,128], index: 8, kind: input, shape index: {}]   ;;  %s3311_s9 = inlined_call_operand.vmem [shape: f32[1,128], index: 9, kind: input, shape index: {}]   ;;  %s3312_s10 = inlined_call_operand.vmem [shape: f32[128,32], index: 10, kind: input, shape index: {}]   ;;  %s3313_s11 = inlined_call_operand.vmem [shape: f32[1,32], index: 11, kind: input, shape index: {}]   ;;  %s3314_s12 = inlined_call_operand.vmem [shape: f32[1,32], index: 12, kind: input, shape index: {}]   ;;  %s3315_s13 = inlined_call_operand.vmem [shape: f32[1,32], index: 13, kind: input, shape index: {}]   ;;  %s3316_s14 = inlined_call_operand.hbm [shape: f32[2,16,32], index: 14, kind: output, shape index: {}]  }
   0x1   :  { %3325 = sst [smem:[#allocation21_spill]] %s3305_s3 }
   0x2   :  { %3326 = sst [smem:[#allocation22_spill]] %s3306_s4 }
   0x3   :  { %3327 = sst [smem:[#allocation23_spill]] %s3310_s8 }
   0x4   :  { %3328 = sst [smem:[#allocation24_spill]] %s3316_s14 }
   0x5   :  { %19 = vsyncpa [#allocation5], 0 }
   0x6   :  { %21 = vsyncpa [#allocation5 + $0x1], 0 }
   0x7   :  { %22 = vsyncpa [#allocation8], 0 }
   0x8   :  { %23 = vsyncpa [#allocation11], 0 }
   0x9   :  { %24 = vsyncpa [#allocation6], 0 }
   0xa   :  { %26 = vsyncpa [#allocation6 + $0x1], 0  ;;  %s2822_s29 = smov 0   ;;  %s2824_s30 = smov 0  }
   0xb   :  { %s2826_s15 = smov 0   ;;  %s2828_s16 = smov 0  }
   0xc LB: > { %3329 = sst [smem:[#allocation17_spill]] %s2713_s29  ;;  %s2843_s17 = sadd.s32 4294967295, %s2725_s16   ;;  %s2725_s16 = sphi %s2828_s16, %s3359_s16   ;;  %s2721_s15 = sphi %s2826_s15, %s3356_s15   ;;  %s2717_s30 = sphi %s2824_s30, %s3358_s30   ;;  %s2713_s29 = sphi %s2822_s29, %s3357_s29  }
   0xd   : > { %3330 = sst [smem:[#allocation18_spill]] %s2721_s15  ;;  %s2147_s18 = sadd.s32 4294967294, %s2725_s16  }
   0xe   : > { %p104_p0 = scmp.ne.s32.totalorder %s2717_s30, %s2713_s29  ;;  %p3319_p1 = scmp.eq.s32.totalorder %s2843_s17, 0 }
   0xf   : > { %p365_p3 = scmp.eq.s32.totalorder %s2147_s18, 1  ;;  %p2148_p5 = scmp.ge.s32.totalorder %s2725_s16, 1 }
  0x10   : > { %p2852_p4 = por %p3319_p1, %p104_p0  ;;  %p372_p7 = scmp.lt.s32.totalorder %s2725_s16, 3 }
  0x11   : > { %p2857_p6 = por %p365_p3, %p104_p0  ;;  %s2731_s22 = smov [#allocation7]  }
  0x12   : > { %s3331_s19 = scalar_select %p2852_p4, 1, 0 }
  0x13   : > { %s3332_s20 = scalar_select %p2857_p6, 1, 0 }
  0x14   : > { %p2862_p8 = pnand %p2148_p5, %p372_p7  ;;  %s384_s23 = sshll.u32 %s2731_s22, 4  ;;  %s385_s23 = int_to_ptr.vmem [resolvable:$true] %s384_s23 }
  0x15   : > { %3333 = sst [smem:[#allocation19_spill]] %s3332_s20  ;;  %s2732_s25 = smov [#allocation9]  }
  0x16   : > { %s3334_s21 = scalar_select %p2862_p8, 1, 0 }
  0x17   : > { %p2443_p9 = pneg %p2862_p8  ;;  %s397_s26 = sshll.u32 %s2732_s25, 4  ;;  %s398_s26 = int_to_ptr.vmem [resolvable:$true] %s397_s26 }
  0x18   : > { %s2733_s27 = smov [#allocation10]   ;;  %s2554_s18 = scalar_lea.vmem %s385_s23, 384 }
  0x19   : > { %p2871_p11 = pnand %p2443_p9, %p3319_p1  ;;  %s419_s28 = sshll.u32 %s2733_s27, 4  ;;  %s420_s28 = int_to_ptr.vmem [resolvable:$true] %s419_s28 }
  0x1a   : > { %p2555_p13 = scmp.ne.s32.totalorder %s385_s23, %s2554_s18  ;;  %p2562_p5 = scmp.lt.s32.totalorder %s385_s23, %s385_s23 }
  0x1b   : > { %p2545_p12 = pneg %p2871_p11  ;;  %p2563_p7 = scmp.lt.s32.totalorder %s2554_s18, %s2554_s18 }
  0x1d   : > { %p2557_p0 = pnand %p2555_p13, %p2545_p12  ;;  %p2564_p9 = por %p2563_p7, %p2562_p5 }
  0x1f   : > { %p2558_p3 = pneg %p2557_p0 }
  0x21   : > { %p2565_p10 = pnand %p2564_p9, %p2558_p3 }
  0x23   : > { %2568 = shalt.err (!%p2565_p10)
}
  0x24   : > { %s2734_s22 = smov 128   ;;  %s2735_s25 = smov 8  }
  0x25   : > { %s3336_s3 = sld [smem:[#allocation21_spill]]  ;;  %s2580_s29 = scalar_lea.vmem %s398_s26, 512 }
  0x26   : > { %p2581_p1 = scmp.ne.s32.totalorder %s398_s26, %s2580_s29  ;;  %p2588_p2 = scmp.lt.s32.totalorder %s398_s26, %s398_s26 }
  0x27   : > { %p2589_p6 = scmp.lt.s32.totalorder %s2580_s29, %s2580_s29 }
  0x28   : > { %p2583_p13 = pnand %p2581_p1, %p2545_p12 }
  0x29   : > { %p2590_p5 = por %p2589_p6, %p2588_p2 }
  0x2a   : > { %p2584_p0 = pneg %p2583_p13 }
  0x2b   : > { %2446 = dma.hbm_to_vmem [thread:$0]  (!%p2871_p11), %s3336_s3, 384, %s385_s23, [#allocation8], %s2734_s22, %s2734_s22, %s2735_s25  }
  0x2c   : > { %p2591_p3 = pnand %p2590_p5, %p2584_p0 }
  0x2e   : > { %2594 = shalt.err (!%p2591_p3)
}
  0x2f   : > { %s3337_s4 = sld [smem:[#allocation22_spill]]  ;;  %s2606_s20 = scalar_lea.vmem %s420_s28, 512 }
  0x30   : > { %p2607_p10 = scmp.ne.s32.totalorder %s420_s28, %s2606_s20  ;;  %p2614_p9 = scmp.lt.s32.totalorder %s420_s28, %s420_s28 }
  0x31   : > { %p2615_p13 = scmp.lt.s32.totalorder %s2606_s20, %s2606_s20 }
  0x32   : > { %p2609_p7 = pnand %p2607_p10, %p2545_p12 }
  0x33   : > { %p2616_p4 = por %p2615_p13, %p2614_p9 }
  0x34   : > { %p2610_p1 = pneg %p2609_p7 }
  0x35   : > { %2449 = dma.hbm_to_vmem [thread:$0]  (!%p2871_p11), %s3337_s4, 512, %s398_s26, [#allocation8], %s2734_s22, %s2734_s22, %s2735_s25  }
  0x36   : > { %p2617_p2 = pnand %p2616_p4, %p2610_p1 }
  0x38   : > { %2620 = shalt.err (!%p2617_p2)
}
  0x39   : > { %s3338_s8 = sld [smem:[#allocation23_spill]]  ;;  %s2902_s14 = sadd.s32 1, %s2725_s16  }
  0x3a   : > { %s88_s26 = ssub.s32 %s2725_s16, %s2902_s14  ;;  %s91_s24 = sadd.s32 1, %s2721_s15 }
  0x3b   : > { %p89_p4 = scmp.eq.s32.totalorder %s88_s26, 0  ;;  %p98_p6 = scmp.ne.s32.totalorder %s2721_s15, %s2717_s30 }
  0x3c   : > { %p99_p12 = scmp.eq.s32.totalorder %s2725_s16, 0  ;;  %p2464_p0 = scmp.lt.s32.totalorder %s2725_s16, 2 }
  0x3d   : > { %s2912_s27 = scalar_select %p89_p4, %s2721_s15, %s91_s24  }
  0x3e   : > { %p100_p5 = por %p99_p12, %p98_p6  ;;  %p3340_p3 = scmp.eq.s32.totalorder %s2843_s17, 1 }
  0x3f   : > { %2452 = dma.hbm_to_vmem [thread:$0]  (!%p2871_p11), %s3338_s8, 512, %s420_s28, [#allocation11], %s2734_s22, %s2734_s22, %s2735_s25  }
  0x40   : > { %3339 = sst [smem:[#allocation20_spill]] %s2912_s27  ;;  %p2916_p10 = por %p3340_p3, %p98_p6 }
  0x41   : > { %s464_s20 = sand.u32 1, %s2721_s15   ;;  %s2208_s29 = sshll.u32 %s2725_s16, 6 }
  0x42   : > { %s3341_s18 = scalar_select %p2916_p10, 1, 0 }
  0x43   : > { %s2153_s28 = sshll.u32 %s464_s20, 2  ;;  %s2925_s23 = scalar_lea.hbm %s3304_s2, %s2208_s29 }
  0x44   : > { %s468_s26 = scalar_lea.vmem [#allocation4], %s2153_s28  ;;  %p2927_p11 = pnand %p2464_p0, %p100_p5 }
  0x45   : > { %s475_s24 = sshll.u32 %s468_s26, 4  ;;  %s2933_s4 = scalar_lea.sflag [#allocation5], %s464_s20  ;;  %s2931_s24 = int_to_ptr.vmem [resolvable:$true] %s475_s24 }
  0x46   : > { %s2621_s8 = scalar_lea.hbm %s2925_s23, 64  ;;  %p2623_p1 = pneg %p2927_p11 }
  0x47   : > { %p2622_p7 = scmp.ne.s32.totalorder %s2925_s23, %s2621_s8  ;;  %s2626_s28 = scalar_lea.hbm %s3304_s2, 128 }
  0x48   : > { %p2627_p2 = scmp.lt.s32.totalorder %s2925_s23, %s3304_s2  ;;  %p2628_p4 = scmp.lt.s32.totalorder %s2626_s28, %s2621_s8 }
  0x49   : > { %p2624_p9 = pnand %p2623_p1, %p2622_p7 }
  0x4a   : > { %p2629_p6 = por %p2628_p4, %p2627_p2 }
  0x4b   : > { %p2625_p13 = pneg %p2624_p9 }
  0x4d   : > { %p2630_p12 = pnand %p2629_p6, %p2625_p13 }
  0x4f   : > { %2633 = shalt.err (!%p2630_p12)
}
  0x50   : > { %s2634_s20 = scalar_lea.vmem %s2931_s24, 64  ;;  %s2736_s27 = smov [#allocation4]  }
  0x51   : > { %p2635_p0 = scmp.ne.s32.totalorder %s2931_s24, %s2634_s20  ;;  %s2639_s15 = sshll.u32 %s2736_s27, 4  ;;  %s2640_s15 = int_to_ptr.vmem [resolvable:$false] %s2639_s15 }
  0x52   : > { %s2641_s29 = scalar_lea.vmem %s2640_s15, 128  ;;  %p2642_p7 = scmp.lt.s32.totalorder %s2931_s24, %s2640_s15 }
  0x53   : > { %p2637_p5 = pnand %p2635_p0, %p2623_p1  ;;  %p2643_p9 = scmp.lt.s32.totalorder %s2641_s29, %s2634_s20 }
  0x55   : > { %p2638_p3 = pneg %p2637_p5  ;;  %p2644_p10 = por %p2643_p9, %p2642_p7 }
  0x57   : > { %p2645_p8 = pnand %p2644_p10, %p2638_p3 }
  0x59   : > { %2648 = shalt.err (!%p2645_p8)
}
  0x5a   : > { %s2737_s8 = smov 32   ;;  %s2738_s22 = smov 2  }
  0x5b   : > { %2456 = dma.hbm_to_vmem [thread:$0]  (!%p2927_p11), %s2925_s23, 64, %s2931_s24, %s2933_s4, %s2737_s8, %s2737_s8, %s2738_s22  }
  0x5c   : > { %p3343_p1 = scmp.ne.s32.totalorder %s3334_s21, 0 }
  0x5d   : > { %s2957_s27 = sand.u32 (!%p3343_p1), 1, %s2717_s30   ;;  %p3344_p8 = scmp.ne.s32.totalorder (!%p3343_p1), %s3331_s19, 0 }
  0x5e   : > { %487 = sbr.rel (%p3343_p1) target bundleno = 2391 (0x957), region = 76  ;;  %s2157_s15 = sshll.u32 (!%p3343_p1), %s2957_s27, 2 }
  0x5f   : > { %s490_s28 = scalar_lea.sflag (!%p3343_p1), [#allocation5], %s2957_s27  ;;  %s493_s25 = scalar_lea.vmem (!%p3343_p1), [#allocation4], %s2157_s15 }
  0x63   : > { %2696 = dma.done.wait (%p3344_p8), %s490_s28, 64  }
  0x64   : > { %2698 = vsyncadd (%p3344_p8), %s490_s28, 4294967232  ;;  %p3345_p10 = scmp.eq.s32.totalorder %s2843_s17, 0 }
  0x66   : > { %2700 = dma.done.wait (%p3345_p10), [#allocation8], 896   ;;  %p3346_p11 = pmov %p3345_p10 }
  0x67   : > { %p3347_p13 = pmov %p3345_p10 }
  0x68   : > { %2702 = vsyncadd (%p3346_p11), [#allocation8], 4294966400 }
  0x69   : > { %2704 = dma.done.wait (%p3347_p13), [#allocation11], 512   ;;  %p3348_p2 = pmov %p3345_p10 }
  0x6a   : > { %s2161_s3 = sshll.u32 %s2957_s27, 4  ;;  %p560_p4 = scmp.lt.s32.totalorder %s2843_s17, 1  ;;  %v2213_v0 = vld [vmem:[%s493_s25] sm:$0xf]   ;;  %v580_v1 = vld [vmem:[#allocation7 + $0x10] sm:$0xff]  ;;  %v579_v2 = vld [vmem:[#allocation7 + $0x8] sm:$0xff] }
  0x6b   : > { %2706 = vsyncadd (%p3348_p2), [#allocation11], 4294966784  ;;  %v2214_v3 = vunpack.c.0.s8 %v2213_v0  ;;  %v2215_v4 = vunpack.c.1.s8 %v2213_v0  ;;  %2281 = vmatprep.subr.mxu0 %v580_v1  ;;  %2421 = vmatprep.subr.mxu1 %v580_v1  ;;  %vm728_vm0 = vcmask 130048   ;;  %v578_v5 = vld [vmem:[#allocation7] sm:$0xff]  ;;  %vm581_vm3 = vcmask 195584   ;;  %s3038_s22 = scalar_lea.vmem [#allocation12], %s2161_s3 }
  0x6c   : > { %s561_s4 = scalar_select %p560_p4, %s2843_s17, 1  ;;  %2282 = vmatpush3.msra.mxu0 %v580_v1  ;;  %2424 = vmatpush3.msra.mxu1 %v580_v1  ;;  %v2739_v6 = vmov 0.0   ;;  %vm711_vm4 = vcmask 64512  }
  0x6d   : > { %vm724_vm1 = vcmp.eq.s32.totalorder %v2214_v3, 0  ;;  %vm725_vm2 = vcmp.eq.s32.totalorder %v2215_v4, 0  ;;  %2283 = vmatprep.subr.mxu0 %v579_v2  ;;  %2422 = vmatprep.subr.mxu1 %v579_v2  ;;  %s3040_s15 = smov 0  }
  0x6e   : > { %s2210_s19 = sshll.u32 %s561_s4, 4  ;;  %s2209_s21 = sshll.u32 %s561_s4, 6  ;;  %v726_v7 = vsel %vm724_vm1, -1.767767e+19, %v2739_v6  ;;  %v727_v8 = vsel %vm725_vm2, -1.767767e+19, %v2739_v6  ;;  %2284 = vmatpush3.msra.mxu0 %v579_v2  ;;  %2425 = vmatpush3.msra.mxu1 %v579_v2 }
  0x6f   : > { %s2979_s26 = scalar_lea.vmem %s3303_s1, %s2210_s19  ;;  %s2984_s8 = scalar_lea.vmem %s3302_s0, %s2209_s21  ;;  %729 = vst.msk [vmem:[#allocation3] sm:$0xff] %vm728_vm0, %v726_v7  ;;  %730 = vst.msk [vmem:[#allocation3 + $0x8] sm:$0xff] %vm728_vm0, %v727_v8  ;;  %2285 = vmatprep.subr.mxu0 %v578_v5  ;;  %2423 = vmatprep.subr.mxu1 %v578_v5 }
  0x70   : > { %v570_v9 = vld [vmem:[%s2984_s8] sm:$0xff]  ;;  %v571_v11 = vld [vmem:[%s2984_s8 + $0x8] sm:$0xff]  ;;  %2286 = vmatpush3.msra.mxu0 %v578_v5  ;;  %2426 = vmatpush3.msra.mxu1 %v578_v5  ;;  %v572_v13 = vld [vmem:[%s2984_s8 + $0x10] sm:$0xff] }
  0x71   : > { %v574_v10 = vld [vmem:[%s2984_s8 + $0x20] sm:$0xff]  ;;  %v575_v12 = vld [vmem:[%s2984_s8 + $0x28] sm:$0xff]  ;;  %v576_v14 = vld [vmem:[%s2984_s8 + $0x30] sm:$0xff]  ;;  %2287 = vmatprep.mubr.msk.f32.mxu0 %vm581_vm3, %v570_v9 }
  0x72   : > { %2293 = vmatprep.mubr.msk.f32.mxu1 %vm581_vm3, %v574_v10  ;;  %2288 = vmatmul.mubr.msk.f32.vlgmr.msra.gmra.mxu0 %vm581_vm3, %v571_v11  ;;  %v573_v15 = vld [vmem:[%s2984_s8 + $0x18] sm:$0xff] }
  0x73   : > { %2294 = vmatmul.mubr.msk.f32.vlgmr.msra.gmra.mxu1 %vm581_vm3, %v575_v12  ;;  %2290 = vmatprep.mubr.msk.f32.mxu0 %vm581_vm3, %v572_v13  ;;  %v577_v16 = vld [vmem:[%s2984_s8 + $0x38] sm:$0xff] }
  0x74   : > { %2296 = vmatprep.mubr.msk.f32.mxu1 %vm581_vm3, %v576_v14 }
  0x76   : > { %2291 = vmatmul.mubr.msk.f32.gmra.mxu0 %vm581_vm3, %v573_v15 }
  0x77   : > { %2297 = vmatmul.mubr.msk.f32.gmra.mxu1 %vm581_vm3, %v577_v16 }
 0x132   : > { %v3004_v17 = vpop.f32.mrf.mxu0 }
 0x133   : > { %v3006_v18 = vpop.f32.mrf.mxu1  ;;  %713 = vst.msk [vmem:[#allocation2 + $0x8] sm:$0xff] %vm711_vm4, %v3004_v17 }
 0x134   : > { %717 = vst.msk [vmem:[#allocation2 + $0x28] sm:$0xff] %vm711_vm4, %v3006_v18  ;;  %v3012_v19 = vpop.f32.mrf.mxu0 }
 0x135   : > { %v3014_v20 = vpop.f32.mrf.mxu1  ;;  %712 = vst.msk [vmem:[#allocation2] sm:$0xff] %vm711_vm4, %v3012_v19 }
 0x136   : > { %716 = vst.msk [vmem:[#allocation2 + $0x20] sm:$0xff] %vm711_vm4, %v3014_v20  ;;  %v3020_v21 = vpop.f32.mrf.mxu0 }
 0x137   : > { %v3022_v22 = vpop.f32.mrf.mxu1  ;;  %715 = vst.msk [vmem:[#allocation2 + $0x18] sm:$0xff] %vm711_vm4, %v3020_v21 }
 0x138   : > { %719 = vst.msk [vmem:[#allocation2 + $0x38] sm:$0xff] %vm711_vm4, %v3022_v22  ;;  %v3028_v23 = vpop.f32.mrf.mxu0 }
 0x139   : > { %v3030_v24 = vpop.f32.mrf.mxu1  ;;  %714 = vst.msk [vmem:[#allocation2 + $0x10] sm:$0xff] %vm711_vm4, %v3028_v23 }
 0x13a   : > { %718 = vst.msk [vmem:[#allocation2 + $0x30] sm:$0xff] %vm711_vm4, %v3030_v24 }
 0x13b LB: >> { %s2740_s28 = smov 120   ;;  %v2741_v25 = vmov 0.0   ;;  %vm2742_vm5 = vmmov 0   ;;  %s3060_s25 = sshll.u32 %s2729_s15, 3  ;;  %vm1753_vm6 = vcmask 261120   ;;  %s2729_s15 = sphi %s3040_s15, %s736_s15  }
 0x13c   : >> { %747 = vrot.lane.b32.xlu0 %v3004_v17, %s2740_s28  ;;  %830 = vrot.lane.b32.xlu1 %v3020_v21, %s2740_s28  ;;  %s738_s3 = scalar_lea.vmem [#allocation2], %s3060_s25  ;;  %s1075_s4 = scalar_lea.vmem [#allocation3], %s3060_s25 }
 0x13d   : >> { %2299 = vmatprep.subr.mxu0 %v2741_v25  ;;  %2303 = vmatprep.mubr.msk.f32.mxu0 %vm2742_vm5, %v2741_v25  ;;  %v1076_v38 = vld [vmem:[%s1075_s4] sm:$0xff]  ;;  %s2743_s19 = smov 112   ;;  %s1750_s21 = scalar_lea.vmem %s2979_s26, %s3060_s25 }
 0x13e   : >> { %2320 = vmatprep.subr.mxu1 %v2741_v25  ;;  %2324 = vmatprep.mubr.msk.f32.mxu1 %vm2742_vm5, %v2741_v25  ;;  %s736_s15 = sadd.s32 1, %s2729_s15  }
 0x13f   : >> { %p733_p6 = scmp.ge.s32.totalorder %s736_s15, 2  }
 0x140   : >> { %745 = vrot.lane.b32.xlu0 %v3012_v19, %s2740_s28  ;;  %828 = vrot.lane.b32.xlu1 %v3028_v23, %s2740_s28  ;;  %s2211_s4 = sshll.u32 (%p733_p6), %s2843_s17, 8  ;;  %s3349_s23 = sld [smem:[#allocation24_spill]] (%p733_p6) }
 0x141   : >> { %v739_v30 = vld [vmem:[%s738_s3] sm:$0xff]  ;;  %v740_v34 = vld [vmem:[%s738_s3 + $0x10] sm:$0xff]  ;;  %s1995_s20 = scalar_lea.sflag (%p733_p6), [#allocation6], %s2957_s27  ;;  %p3350_p0 = scmp.ne.s32.totalorder (%p733_p6), %s3341_s18, 0 }
 0x142   : >> { %v742_v35 = vld [vmem:[%s738_s3 + $0x30] sm:$0xff]  ;;  %v741_v37 = vld [vmem:[%s738_s3 + $0x20] sm:$0xff]  ;;  %s1992_s3 = scalar_lea.vmem %s3038_s22, %s3060_s25 [#allocation12]  ;;  %s2008_s25 = sshll.u32 (%p733_p6), %s3038_s22, 4  ;;  %s3259_s25 = int_to_ptr.vmem [resolvable:$true] %s2008_s25 }
 0x143   : > { %s2649_s29 = scalar_lea.vmem (%p733_p6), %s3259_s25, 256  ;;  %s2744_s26 = smov (%p733_p6), [#allocation12]  }
 0x144   : >> { %913 = vrot.lane.b32.xlu0 %v3006_v18, %s2740_s28  ;;  %996 = vrot.lane.b32.xlu1 %v3022_v22, %s2740_s28  ;;  %p2650_p12 = scmp.ne.s32.totalorder (%p733_p6), %s3259_s25, %s2649_s29  ;;  %s2653_s15 = sshll.u32 (%p733_p6), %s2744_s26, 4  ;;  %s2654_s15 = int_to_ptr.vmem [resolvable:$false] %s2653_s15 }
 0x145   : > { %s2655_s17 = scalar_lea.vmem (%p733_p6), %s2654_s15, 512  ;;  %p2656_p7 = scmp.lt.s32.totalorder (%p733_p6), %s3259_s25, %s2654_s15 }
 0x146   : > { %s3256_s24 = scalar_lea.hbm (%p733_p6), %s3349_s23, %s2211_s4  ;;  %p2651_p5 = pnand (%p733_p6), %p2650_p12, %p3350_p0 }
 0x147   : > { %p2657_p9 = scmp.lt.s32.totalorder (%p733_p6), %s2655_s17, %s2649_s29 }
 0x148   : >> { %911 = vrot.lane.b32.xlu0 %v3014_v20, %s2740_s28  ;;  %994 = vrot.lane.b32.xlu1 %v3030_v24, %s2740_s28  ;;  %p2652_p3 = pneg (%p733_p6), %p2651_p5 }
 0x149   : > { %p2658_p1 = por (%p733_p6), %p2657_p9, %p2656_p7 }
 0x14b   : > { %p2659_p8 = pnand (%p733_p6), %p2658_p1, %p2652_p3 }
 0x1ae   : >> { %v748_v26 = vpop.permute.xlu0 %747  ;;  %v831_v27 = vpop.permute.xlu1 %830 }
 0x1af   : >> { %2300 = vmatpush3.xpose.msk.msra.mxu0 %vm711_vm4, %v748_v26 }
 0x1b0   : >> { %2301 = vmatprep.subr.mxu0 %v2741_v25 }
 0x1b2   : >> { %v746_v28 = vpop.permute.xlu0 %745  ;;  %v829_v29 = vpop.permute.xlu1 %828 }
 0x1b3   : >> { %2302 = vmatpush3.xpose.msk.msra.mxu0 %vm711_vm4, %v746_v28 }
 0x1b4   : >> { %2306 = vmatprep.subr.mxu0 %v2741_v25 }
 0x1b6   : >> { %2304 = vmatmul.mubr.msk.f32.vlgmr.msra.gmra.mxu0 %vm711_vm4, %v739_v30  ;;  %v997_v31 = vpop.permute.xlu1 %996  ;;  %v914_v32 = vpop.permute.xlu0 %913 }
 0x1b7   : >> { %2307 = vmatpush3.xpose.msk.msra.mxu0 %vm711_vm4, %v831_v27  ;;  %2310 = vmatprep.mubr.msk.f32.mxu0 %vm2742_vm5, %v2741_v25 }
 0x1b8   : >> { %2308 = vmatprep.subr.mxu0 %v2741_v25  ;;  %2321 = vmatpush3.xpose.msk.msra.mxu1 %vm711_vm4, %v997_v31 }
 0x1b9   : >> { %2322 = vmatprep.subr.mxu1 %v2741_v25 }
 0x1ba   : >> { %v995_v33 = vpop.permute.xlu1 %994  ;;  %v912_v36 = vpop.permute.xlu0 %911 }
 0x1bb   : >> { %2309 = vmatpush3.xpose.msk.msra.mxu0 %vm711_vm4, %v829_v29 }
 0x1bc   : >> { %2313 = vmatprep.subr.mxu0 %v2741_v25  ;;  %2323 = vmatpush3.xpose.msk.msra.mxu1 %vm711_vm4, %v995_v33 }
 0x1bd   : >> { %2348 = vmatprep.subr.mxu1 %v2741_v25 }
 0x1be   : >> { %2311 = vmatmul.mubr.msk.f32.vlgmr.msra.gmra.mxu0 %vm711_vm4, %v740_v34 }
 0x1bf   : >> { %2314 = vmatpush3.xpose.msk.msra.mxu0 %vm711_vm4, %v914_v32  ;;  %2317 = vmatprep.mubr.msk.f32.mxu0 %vm2742_vm5, %v2741_v25 }
 0x1c0   : >> { %2315 = vmatprep.subr.mxu0 %v2741_v25  ;;  %2325 = vmatmul.mubr.msk.f32.vlgmr.msra.gmra.mxu1 %vm711_vm4, %v742_v35 }
 0x1c1   : >> { %2352 = vmatprep.mubr.msk.f32.mxu1 %vm2742_vm5, %v2741_v25 }
 0x1c3   : >> { %2316 = vmatpush3.xpose.msk.msra.mxu0 %vm711_vm4, %v912_v36 }
 0x1c4   : >> { %2327 = vmatprep.subr.mxu0 %v2741_v25 }
 0x1c6   : >> { %2318 = vmatmul.mubr.msk.f32.vlgmr.msra.gmra.mxu0 %vm711_vm4, %v741_v37 }
 0x1c7   : >> { %2331 = vmatprep.mubr.msk.f32.mxu0 %vm2742_vm5, %v2741_v25 }
 0x276   : >> { %v822_v39 = vpop.f32.mrf.mxu0 }
 0x277   : >> { %v1077_v40 = vadd.f32 %v1076_v38, %v822_v39 }
 0x278   : >> { %v2305_v41 = vpop.f32.mrf.mxu0 }
 0x279   : >> { %v1081_v42 = vsel %vm728_vm0, %v1077_v40, -inf  ;;  %v1443_v41 = vld [vmem:[#allocation9 + $0x8] sm:$0xff] }
 0x27a   : >> { %1082 = vmax.xlane.f32.xlu0 %v1081_v42  ;;  %v1667_v42 = vld [vmem:[#allocation9 + $0x18] sm:$0xff] }
 0x27e   : >> { %v905_v43 = vpop.f32.mrf.mxu0 }
 0x27f   : >> { %v1078_v44 = vadd.f32 %v1076_v38, %v905_v43 }
 0x280   : >> { %v2312_v45 = vpop.f32.mrf.mxu0  ;;  %v1071_v46 = vpop.f32.mrf.mxu1 }
 0x281   : >> { %v1084_v47 = vsel %vm728_vm0, %v1078_v44, -inf  ;;  %v1080_v51 = vadd.f32 %v1076_v38, %v1071_v46 }
 0x282   : >> { %1085 = vmax.xlane.f32.xlu1 %v1084_v47  ;;  %v2326_v48 = vpop.f32.mrf.mxu1  ;;  %v1591_v47 = vld [vmem:[#allocation9 + $0x10] sm:$0xff] }
 0x283   : >> { %v1090_v54 = vsel %vm728_vm0, %v1080_v51, -inf }
 0x286   : >> { %v988_v49 = vpop.f32.mrf.mxu0 }
 0x287   : >> { %v1079_v50 = vadd.f32 %v1076_v38, %v988_v49 }
 0x288   : >> { %v2319_v52 = vpop.f32.mrf.mxu0 }
 0x289   : >> { %v1087_v53 = vsel %vm728_vm0, %v1079_v50, -inf }
 0x28a   : >> { %1088 = vmax.xlane.f32.xlu0 %v1087_v53 }
 0x28e   : >> { %1091 = vmax.xlane.f32.xlu0 %v1090_v54 }
 0x293   : >> { %1127 = vrot.lane.b32.xlu1 %v3004_v17, %s2743_s19 }
 0x297   : >> { %1206 = vrot.lane.b32.xlu1 %v3020_v21, %s2743_s19 }
 0x29b   : >> { %1204 = vrot.lane.b32.xlu1 %v3028_v23, %s2743_s19 }
 0x29f   : >> { %1283 = vrot.lane.b32.xlu1 %v3014_v20, %s2743_s19 }
 0x2a4   : >> { %1125 = vrot.lane.b32.xlu0 %v3012_v19, %s2743_s19 }
 0x2a8   : >> { %1285 = vrot.lane.b32.xlu0 %v3006_v18, %s2743_s19 }
 0x303   : >> { %v1083_v55 = vpop.xlane.xlu0 %1082 }
 0x304   : >> { %v1093_v56 = vsub.f32 %v1077_v40, %v1083_v55  ;;  %v1441_v40 = vld [vmem:[#allocation9] sm:$0xff] }
 0x306   : >> { %v1097_v57 = vmul.f32 1.442695, %v1093_v56 }
 0x308   : >> { %2523 = vpow2.f32 %v1097_v57 }
 0x30b   : >> { %v1086_v58 = vpop.xlane.xlu1 %1085 }
 0x30c   : >> { %v1094_v63 = vsub.f32 %v1078_v44, %v1086_v58 }
 0x30e   : >> { %v1099_v4 = vmul.f32 1.442695, %v1094_v63 }
 0x30f   : >> { %v1128_v59 = vpop.permute.xlu1 %1127 }
 0x310   : >> { %2328 = vmatpush3.msra.mxu0 %v1128_v59 }
 0x311   : >> { %2329 = vmatprep.subr.mxu0 %v2741_v25 }
 0x313   : >> { %v1089_v60 = vpop.xlane.xlu0 %1088  ;;  %v1207_v13 = vpop.permute.xlu1 %1206 }
 0x314   : >> { %v1095_v61 = vsub.f32 %v1079_v50, %v1089_v60 }
 0x315   : >> { %v2524_v62 = vpop.eup %2523 }
 0x316   : >> { %v1101_v0 = vmul.f32 1.442695, %v1095_v61  ;;  %v1105_v1 = vsel %vm728_vm0, %v2524_v62, 0.0 }
 0x317   : >> { %1106 = vadd.xlane.f32.xlu1 %v1105_v1  ;;  %v1092_v2 = vpop.xlane.xlu0 %1091  ;;  %v1205_v14 = vpop.permute.xlu1 %1204 }
 0x318   : >> { %2525 = vpow2.f32 %v1101_v0  ;;  %v1096_v3 = vsub.f32 %v1080_v51, %v1092_v2  ;;  %v1751_v0 = vld [vmem:[%s1750_s21] sm:$0xff] }
 0x31a   : >> { %v1103_v5 = vmul.f32 1.442695, %v1096_v3 }
 0x31b   : >> { %v1126_v6 = vpop.permute.xlu0 %1125  ;;  %v1284_v15 = vpop.permute.xlu1 %1283 }
 0x31c   : >> { %2527 = vpow2.f32 %v1103_v5  ;;  %2330 = vmatpush3.msra.mxu0 %v1126_v6 }
 0x31d   : >> { %2334 = vmatprep.subr.mxu0 %v2741_v25  ;;  %2529 = vpow2.f32 %v1099_v4 }
 0x31f   : >> { %v1286_v28 = vpop.permute.xlu0 %1285 }
 0x325   : >> { %v2526_v7 = vpop.eup %2525 }
 0x326   : >> { %v1111_v8 = vsel %vm728_vm0, %v2526_v7, 0.0 }
 0x327   : >> { %1112 = vadd.xlane.f32.xlu1 %v1111_v8 }
 0x329   : >> { %v2528_v9 = vpop.eup %2527 }
 0x32a   : >> { %v1114_v10 = vsel %vm728_vm0, %v2528_v9, 0.0  ;;  %v2530_v11 = vpop.eup %2529 }
 0x32b   : >> { %1115 = vadd.xlane.f32.xlu0 %v1114_v10  ;;  %v1108_v12 = vsel %vm728_vm0, %v2530_v11, 0.0  ;;  %v1786_v10 = vld [vmem:[#allocation10 + $0x10] sm:$0xff] }
 0x32f   : >> { %1109 = vadd.xlane.f32.xlu0 %v1108_v12  ;;  %v1784_v12 = vld [vmem:[#allocation10] sm:$0xff] }
 0x338   : >> { %1362 = vrot.lane.b32.xlu1 %v3030_v24, %s2743_s19 }
 0x345   : >> { %1364 = vrot.lane.b32.xlu0 %v3022_v22, %s2743_s19 }
 0x3a0   : >> { %v1107_v16 = vpop.xlane.xlu1 %1106 }
 0x3a1   : >> { %2531 = vrcp.f32 %v1107_v16  ;;  %v1881_v16 = vld [vmem:[%s3312_s10 + $0x60] sm:$0xff] }
 0x3ae   : >> { %v2532_v26 = vpop.eup %2531 }
 0x3af   : >> { %v1118_v27 = vmul.f32 %v2532_v26, %v2524_v62  ;;  %v2195_v62 = vld [vmem:[%s3307_s5] ss:$0 sm:$0xff]  ;;  %v1880_v26 = vld [vmem:[%s3312_s10 + $0x58] sm:$0xff] }
 0x3b0   : >> { %v1113_v30 = vpop.xlane.xlu1 %1112 }
 0x3b1   : >> { %2332 = vmatmul.mubr.msk.f32.vlgmr.msra.gmra.mxu0 %vm728_vm0, %v1118_v27  ;;  %v1879_v27 = vld [vmem:[%s3312_s10 + $0x50] sm:$0xff] }
 0x3b2   : >> { %2335 = vmatpush3.msra.mxu0 %v1207_v13  ;;  %2338 = vmatprep.mubr.msk.f32.mxu0 %vm2742_vm5, %v2741_v25  ;;  %v1884_v13 = vld [vmem:[%s3312_s10 + $0x78] sm:$0xff] }
 0x3b3   : >> { %2336 = vmatprep.subr.mxu0 %v2741_v25 }
 0x3b4   : >> { %2337 = vmatpush3.msra.mxu0 %v1205_v14  ;;  %v1116_v29 = vpop.xlane.xlu0 %1115  ;;  %v1363_v33 = vpop.permute.xlu1 %1362  ;;  %v1883_v14 = vld [vmem:[%s3312_s10 + $0x70] sm:$0xff] }
 0x3b5   : >> { %2533 = vrcp.f32 %v1116_v29  ;;  %2341 = vmatprep.subr.mxu0 %v2741_v25  ;;  %v1877_v29 = vld [vmem:[%s3312_s10 + $0x40] sm:$0xff] }
 0x3b8   : >> { %v1110_v31 = vpop.xlane.xlu0 %1109 }
 0x3b9   : >> { %2535 = vrcp.f32 %v1110_v31  ;;  %v1875_v31 = vld [vmem:[%s3312_s10 + $0x30] sm:$0xff] }
 0x3ba   : >> { %2537 = vrcp.f32 %v1113_v30  ;;  %v1876_v30 = vld [vmem:[%s3312_s10 + $0x38] sm:$0xff] }
 0x3bc   : >> { %v1365_v32 = vpop.permute.xlu0 %1364 }
 0x3bd   : >> { %2349 = vmatpush3.msra.mxu1 %v1365_v32  ;;  %v1874_v32 = vld [vmem:[%s3312_s10 + $0x28] sm:$0xff] }
 0x3be   : >> { %2350 = vmatprep.subr.mxu1 %v2741_v25 }
 0x3bf   : >> { %2351 = vmatpush3.msra.mxu1 %v1363_v33  ;;  %v1873_v33 = vld [vmem:[%s3312_s10 + $0x20] sm:$0xff] }
 0x3c0   : >> { %2360 = vmatprep.subr.mxu1 %v2741_v25 }
 0x3c2   : >> { %v2534_v34 = vpop.eup %2533 }
 0x3c3   : >> { %v1124_v35 = vmul.f32 %v2534_v34, %v2528_v9  ;;  %v1787_v9 = vld [vmem:[#allocation10 + $0x18] sm:$0xff]  ;;  %v1872_v34 = vld [vmem:[%s3312_s10 + $0x18] sm:$0xff] }
 0x3c5   : >> { %2353 = vmatmul.mubr.msk.f32.vlgmr.msra.gmra.mxu1 %vm728_vm0, %v1124_v35 }
 0x3c6   : >> { %v2536_v36 = vpop.eup %2535  ;;  %2362 = vmatprep.mubr.msk.f32.mxu1 %vm2742_vm5, %v2741_v25  ;;  %2361 = vmatpush3.msra.mxu1 %v1441_v40 }
 0x3c7   : >> { %v1120_v37 = vmul.f32 %v2536_v36, %v2530_v11  ;;  %v2538_v38 = vpop.eup %2537  ;;  %2370 = vmatprep.subr.mxu1 %v2741_v25  ;;  %v1785_v11 = vld [vmem:[#allocation10 + $0x8] sm:$0xff] }
 0x3c8   : >> { %v1122_v39 = vmul.f32 %v2538_v38, %v2526_v7 }
 0x3c9   : >> { %2339 = vmatmul.mubr.msk.f32.vlgmr.msra.gmra.mxu0 %vm728_vm0, %v1120_v37 }
 0x3ca   : >> { %2342 = vmatpush3.msra.mxu0 %v1286_v28  ;;  %2345 = vmatprep.mubr.msk.f32.mxu0 %vm2742_vm5, %v2741_v25  ;;  %v1878_v28 = vld [vmem:[%s3312_s10 + $0x48] sm:$0xff] }
 0x3cb   : >> { %2343 = vmatprep.subr.mxu0 %v2741_v25 }
 0x3cc   : >> { %2344 = vmatpush3.msra.mxu0 %v1284_v15  ;;  %v1882_v15 = vld [vmem:[%s3312_s10 + $0x68] sm:$0xff] }
 0x3cd   : >> { %2346 = vmatmul.mubr.msk.f32.vlgmr.msra.gmra.mxu0 %vm728_vm0, %v1122_v39  ;;  %2355 = vmatprep.subr.mxu0 %v2741_v25  ;;  %v2196_v39 = vld [vmem:[%s3308_s6] ss:$0 sm:$0xff] }
 0x3ce   : >> { %2357 = vmatprep.mubr.msk.f32.mxu0 %vm2742_vm5, %v2741_v25  ;;  %2356 = vmatpush3.msra.mxu0 %v1443_v41  ;;  %v2197_v41 = vld [vmem:[%s3309_s7] ss:$0 sm:$0xff] }
 0x3cf   : >> { %2365 = vmatprep.subr.mxu0 %v2741_v25 }
 0x471   : >> { %v1200_v43 = vpop.f32.mrf.mxu0 }
 0x472   : >> { %2363 = vmatmul.mubr.msk.f32.vlgmr.msra.gmra.mxu1 %vm711_vm4, %v1200_v43 }
 0x473   : >> { %v2333_v44 = vpop.f32.mrf.mxu0  ;;  %2371 = vmatpush3.msra.mxu1 %v1667_v42  ;;  %2372 = vmatprep.mubr.msk.f32.mxu1 %vm2742_vm5, %v2741_v25 }
 0x474   : >> { %2386 = vmatprep.subr.mxu1 %v2741_v25  ;;  %v1871_v44 = vld [vmem:[%s3312_s10 + $0x10] sm:$0xff] }
 0x485   : >> { %v1437_v45 = vpop.f32.mrf.mxu1 }
 0x486   : >> { %2373 = vmatmul.mubr.msk.f32.vlgmr.msra.gmra.mxu1 %vm711_vm4, %v1437_v45  ;;  %v1870_v45 = vld [vmem:[%s3312_s10 + $0x8] sm:$0xff] }
 0x487   : >> { %v2354_v46 = vpop.f32.mrf.mxu1  ;;  %2418 = vmatprep.mubr.msk.f32.mxu1 %vm2742_vm5, %v2741_v25  ;;  %2387 = vmatpush3.msra.mxu1 %v1884_v13 }
 0x488   : >> { %2388 = vmatprep.subr.mxu1 %v2741_v25  ;;  %v1869_v46 = vld [vmem:[%s3312_s10] sm:$0xff] }
 0x489   : >> { %v1279_v48 = vpop.f32.mrf.mxu0  ;;  %2389 = vmatpush3.msra.mxu1 %v1883_v14 }
 0x48a   : >> { %2358 = vmatmul.mubr.msk.f32.vlgmr.msra.gmra.mxu0 %vm711_vm4, %v1279_v48  ;;  %2390 = vmatprep.subr.mxu1 %v2741_v25 }
 0x48b   : >> { %2366 = vmatpush3.msra.mxu0 %v1591_v47  ;;  %v2340_v49 = vpop.f32.mrf.mxu0  ;;  %2367 = vmatprep.mubr.msk.f32.mxu0 %vm2742_vm5, %v2741_v25  ;;  %v2198_v47 = vld [vmem:[%s3311_s9] ss:$0 sm:$0xff] }
 0x48c   : >> { %2375 = vmatprep.subr.mxu0 %v2741_v25  ;;  %2391 = vmatpush3.msra.mxu1 %v1882_v15 }
 0x48d   : >> { %v1358_v50 = vpop.f32.mrf.mxu0  ;;  %2392 = vmatprep.subr.mxu1 %v2741_v25 }
 0x48e   : >> { %2368 = vmatmul.mubr.msk.f32.vlgmr.msra.gmra.mxu0 %vm711_vm4, %v1358_v50  ;;  %2393 = vmatpush3.msra.mxu1 %v1881_v16 }
 0x48f   : >> { %v2347_v51 = vpop.f32.mrf.mxu0  ;;  %2383 = vmatprep.mubr.msk.f32.mxu0 %vm2742_vm5, %v2741_v25  ;;  %2376 = vmatpush3.msra.mxu0 %v1787_v9 }
 0x490   : >> { %2377 = vmatprep.subr.mxu0 %v2741_v25  ;;  %2394 = vmatprep.subr.mxu1 %v2741_v25 }
 0x491   : >> { %2378 = vmatpush3.msra.mxu0 %v1786_v10  ;;  %2395 = vmatpush3.msra.mxu1 %v1880_v26 }
 0x492   : >> { %2379 = vmatprep.subr.mxu0 %v2741_v25  ;;  %2396 = vmatprep.subr.mxu1 %v2741_v25 }
 0x493   : >> { %2380 = vmatpush3.msra.mxu0 %v1785_v11  ;;  %2397 = vmatpush3.msra.mxu1 %v1879_v27 }
 0x494   : >> { %2381 = vmatprep.subr.mxu0 %v2741_v25  ;;  %2398 = vmatprep.subr.mxu1 %v2741_v25 }
 0x495   : >> { %2382 = vmatpush3.msra.mxu0 %v1784_v12  ;;  %2399 = vmatpush3.msra.mxu1 %v1878_v28 }
 0x496   : >> { %2400 = vmatprep.subr.mxu1 %v2741_v25 }
 0x497   : >> { %2401 = vmatpush3.msra.mxu1 %v1877_v29 }
 0x498   : >> { %2402 = vmatprep.subr.mxu1 %v2741_v25 }
 0x499   : >> { %2403 = vmatpush3.msra.mxu1 %v1876_v30 }
 0x49a   : >> { %2404 = vmatprep.subr.mxu1 %v2741_v25 }
 0x49b   : >> { %2405 = vmatpush3.msra.mxu1 %v1875_v31 }
 0x49c   : >> { %2406 = vmatprep.subr.mxu1 %v2741_v25 }
 0x49d   : >> { %2407 = vmatpush3.msra.mxu1 %v1874_v32 }
 0x49e   : >> { %2408 = vmatprep.subr.mxu1 %v2741_v25 }
 0x49f   : >> { %2409 = vmatpush3.msra.mxu1 %v1873_v33 }
 0x4a0   : >> { %2410 = vmatprep.subr.mxu1 %v2741_v25 }
 0x4a1   : >> { %2411 = vmatpush3.msra.mxu1 %v1872_v34 }
 0x4a2   : >> { %2412 = vmatprep.subr.mxu1 %v2741_v25 }
 0x4a3   : >> { %2413 = vmatpush3.msra.mxu1 %v1871_v44 }
 0x4a4   : >> { %2414 = vmatprep.subr.mxu1 %v2741_v25 }
 0x4a5   : >> { %2415 = vmatpush3.msra.mxu1 %v1870_v45 }
 0x4a6   : >> { %2416 = vmatprep.subr.mxu1 %v2741_v25 }
 0x4a7   : >> { %2417 = vmatpush3.msra.mxu1 %v1869_v46 }
 0x532   : >> { %v1586_v52 = vpop.f32.mrf.mxu1 }
 0x534   : >> { %v2364_v53 = vpop.f32.mrf.mxu1 }
 0x546   : >> { %v1737_v54 = vpop.f32.mrf.mxu1 }
 0x548   : >> { %v2374_v55 = vpop.f32.mrf.mxu1 }
 0x54a   : >> { %v1513_v56 = vpop.f32.mrf.mxu0 }
 0x54b   : >> { %v1587_v58 = vadd.f32 %v1586_v52, %v1513_v56  ;;  %v2200_v52 = vld [vmem:[%s3313_s11] ss:$0 sm:$0xff] }
 0x54c   : >> { %v2359_v57 = vpop.f32.mrf.mxu0 }
 0x54e   : >> { %v1661_v59 = vpop.f32.mrf.mxu0 }
 0x54f   : >> { %v1665_v60 = vadd.f32 %v1661_v59, %v1587_v58 }
 0x550   : >> { %v2369_v61 = vpop.f32.mrf.mxu0 }
 0x551   : >> { %v1741_v63 = vadd.f32 %v1737_v54, %v1665_v60 }
 0x553   : >> { %v1749_v1 = vadd.f32 %v2195_v62, %v1741_v63 }
 0x555   : >> { %v1752_v2 = vadd.f32 %v1751_v0, %v1749_v1 }
 0x557   : >> { %v1754_v3 = vsel %vm1753_vm6, %v1752_v2, 0.0 }
 0x558   : >> { %1755 = vadd.xlane.f32.xlu0 %v1754_v3 }
 0x5e1   : >> { %v1756_v4 = vpop.xlane.xlu0 %1755 }
 0x5e2   : >> { %v1758_v5 = vmul.f32 0.03125, %v1756_v4  ;;  %v2202_v4 = vld [vmem:[%s3315_s13] ss:$0 sm:$0xff] }
 0x5e4   : >> { %v1759_v6 = vsub.f32 %v1752_v2, %v1758_v5  ;;  %v2201_v2 = vld [vmem:[%s3314_s12] ss:$0 sm:$0xff] }
 0x5e6   : >> { %v1760_v7 = vmul.f32 %v1759_v6, %v1759_v6 }
 0x5e8   : >> { %v1761_v8 = vsel %vm1753_vm6, %v1760_v7, 0.0 }
 0x5e9   : >> { %1762 = vadd.xlane.f32.xlu1 %v1761_v8 }
 0x672   : >> { %v1763_v35 = vpop.xlane.xlu1 %1762 }
 0x673   : >> { %v1764_v36 = vmul.f32 0.03125, %v1763_v35 }
 0x675   : >> { %v1765_v37 = vadd.f32 1e-05, %v1764_v36 }
 0x677   : >> { %2539 = vrsqrt.f32 %v1765_v37 }
 0x684   : >> { %v2540_v38 = vpop.eup %2539 }
 0x685   : >> { %v1767_v40 = vmul.f32 %v2540_v38, %v1759_v6 }
 0x687   : >> { %v1775_v42 = vmul.f32 %v2196_v39, %v1767_v40 }
 0x689   : >> { %v1783_v43 = vadd.f32 %v2197_v41, %v1775_v42 }
 0x68b   : >> { %2384 = vmatmul.mubr.msk.f32.vlgmr.msra.gmra.mxu0 %vm1753_vm6, %v1783_v43 }
 0x74b   : >> { %v1864_v48 = vpop.f32.mrf.mxu0 }
 0x74c   : >> { %v1865_v49 = vadd.f32 %v2198_v47, %v1864_v48 }
 0x74d   : >> { %v2385_v50 = vpop.f32.mrf.mxu0 }
 0x74e   : >> { %v1868_v51 = vmax.f32 %v1865_v49, 0.0 }
 0x750   : >> { %2419 = vmatmul.mubr.f32.vlgmr.msra.gmra.mxu1 %v1868_v51 }
 0x810   : >> { %v1958_v53 = vpop.f32.mrf.mxu1 }
 0x811   : >> { %v1959_v54 = vadd.f32 %v2200_v52, %v1958_v53 }
 0x812   : >> { %v2420_v55 = vpop.f32.mrf.mxu1 }
 0x813   : >> { %v1962_v56 = vadd.f32 %v1959_v54, %v1783_v43 }
 0x815   : >> { %v1963_v25 = vsel %vm1753_vm6, %v1962_v56, 0.0 }
 0x816   : >> { %1964 = vadd.xlane.f32.xlu0 %v1963_v25 }
 0x89f   : >> { %v1965_v57 = vpop.xlane.xlu0 %1964 }
 0x8a0   : >> { %v1966_v58 = vmul.f32 0.03125, %v1965_v57 }
 0x8a2   : >> { %v1967_v59 = vsub.f32 %v1962_v56, %v1966_v58 }
 0x8a4   : >> { %v1968_v60 = vmul.f32 %v1967_v59, %v1967_v59 }
 0x8a6   : >> { %v1969_v61 = vsel %vm1753_vm6, %v1968_v60, 0.0 }
 0x8a7   : >> { %1970 = vadd.xlane.f32.xlu0 %v1969_v61 }
 0x930   : >> { %v1971_v62 = vpop.xlane.xlu0 %1970 }
 0x931   : >> { %v1972_v63 = vmul.f32 0.03125, %v1971_v62 }
 0x933   : >> { %v1973_v0 = vadd.f32 1e-05, %v1972_v63 }
 0x935   : >> { %2541 = vrsqrt.f32 %v1973_v0 }
 0x942   : >> { %v2542_v1 = vpop.eup %2541 }
 0x943   : >> { %v1975_v3 = vmul.f32 %v2542_v1, %v1967_v59 }
 0x945   : >> { %v1983_v5 = vmul.f32 %v2201_v2, %v1975_v3  ;;  %735 = sbr.rel (!%p733_p6) target bundleno = 315 (0x13b), region = 153 }
 0x947   : >> { %v1991_v6 = vadd.f32 %v2202_v4, %v1983_v5 }
 0x949   : >> { %1993 = vst.msk [vmem:[%s1992_s3] sm:$0xff] %vm1753_vm6, %v1991_v6 }
 0x94a   : > { %2662 = shalt.err (!%p2659_p8)
}
 0x94b   : > { %s2663_s22 = scalar_lea.hbm %s3256_s24, 256  ;;  %s2667_s3 = scalar_lea.hbm %s3349_s23, 512 }
 0x94c   : > { %p2664_p10 = scmp.ne.s32.totalorder %s3256_s24, %s2663_s22  ;;  %p2668_p2 = scmp.lt.s32.totalorder %s3256_s24, %s3349_s23 }
 0x94d   : > { %p2669_p4 = scmp.lt.s32.totalorder %s2667_s3, %s2663_s22 }
 0x94e   : > { %p2665_p11 = pnand %p2664_p10, %p3350_p0 }
 0x94f   : > { %p2670_p6 = por %p2669_p4, %p2668_p2 }
 0x950   : > { %p2666_p13 = pneg %p2665_p11 }
 0x952   : > { %p2671_p12 = pnand %p2670_p6, %p2666_p13 }
 0x954   : > { %2674 = shalt.err (!%p2671_p12)
}
 0x955   : > { %s2745_s21 = smov 128   ;;  %s2746_s29 = smov 8  }
 0x956   : > { %2441 = dma.vmem_to_hbm [thread:$0]  (%p3350_p0), %s3259_s25, 256, %s3256_s24, %s1995_s20, %s2745_s21, %s2745_s21, %s2746_s29  }
 0x957 PF: > { %s3351_s26 = sld [smem:[#allocation17_spill]]  ;;  %p3354_p3 = scmp.ge.s32.totalorder %s2725_s16, 2 }
 0x958   : > { %s3352_s15 = sld [smem:[#allocation19_spill]] }
 0x95d   : > { %s2023_s17 = sand.u32 1, %s3351_s26  }
 0x95e   : > { %p3353_p5 = scmp.ne.s32.totalorder %s3352_s15, 0  ;;  %s2024_s22 = scalar_lea.sflag [#allocation6], %s2023_s17 }
 0x960   : > { %p2458_p7 = pnand %p3354_p3, %p3353_p5 }
 0x962   : > { %p2459_p9 = pneg %p2458_p7 }
 0x964   : > { %2708 = dma.done.wait (%p2459_p9), %s2024_s22, 256  }
 0x965   : > { %2710 = vsyncadd (%p2459_p9), %s2024_s22, 4294967040  ;;  %s3355_s8 = sld [smem:[#allocation18_spill]]  ;;  %p29_p1 = scmp.ge.s32.totalorder %s2902_s14, 4  }
 0x966   : > { %s3356_s15 = sld [smem:[#allocation20_spill]]  ;;  %s3357_s29 = smov %s2717_s30 }
 0x967   : > { %s3359_s16 = smov %s2902_s14  ;;  %31 = sbr.rel (!%p29_p1) target bundleno = 12 (0xc), region = 164 }
 0x96b   : > { %s3358_s30 = smov %s3355_s8 }
 0x96c   :  { %2029 = vsyncpa [#allocation5], 1 }
 0x96d   :  { %2031 = vsyncpa [#allocation5 + $0x1], 1 }
 0x96e   :  { %2032 = vsyncpa [#allocation8], 1 }
 0x96f   :  { %2033 = vsyncpa [#allocation11], 1 }
 0x970   :  { %2034 = vsyncpa [#allocation6], 1 }
 0x971   :  { %2036 = vsyncpa [#allocation6 + $0x1], 1 }

// kernel: tpu_custom_call.1
= control target key start
LH: loop header
LB: loop body
LE: loop exit
PB: predicated region body
PF: predicated region fallthrough
CT: control target
= control target key end

     0   :  { %s3302_s0 = inlined_call_operand.vmem [shape: f32[2,4,16,24], index: 0, kind: input, shape index: {}]   ;;  %s3303_s1 = inlined_call_operand.vmem [shape: f32[2,16,32], index: 1, kind: input, shape index: {}]   ;;  %s3304_s2 = inlined_call_operand.hbm [shape: s8[2,16,16], index: 2, kind: input, shape index: {}]   ;;  %s3305_s3 = inlined_call_operand.hbm [shape: f32[24,24], index: 3, kind: input, shape index: {}]   ;;  %s3306_s4 = inlined_call_operand.hbm [shape: f32[4,8,32], index: 4, kind: input, shape index: {}]   ;;  %s3307_s5 = inlined_call_operand.vmem [shape: f32[1,32], index: 5, kind: input, shape index: {}]   ;;  %s3308_s6 = inlined_call_operand.vmem [shape: f32[1,32], index: 6, kind: input, shape index: {}]   ;;  %s3309_s7 = inlined_call_operand.vmem [shape: f32[1,32], index: 7, kind: input, shape index: {}]   ;;  %s3310_s8 = inlined_call_operand.hbm [shape: f32[32,128], index: 8, kind: input, shape index: {}]   ;;  %s3311_s9 = inlined_call_operand.vmem [shape: f32[1,128], index: 9, kind: input, shape index: {}]   ;;  %s3312_s10 = inlined_call_operand.vmem [shape: f32[128,32], index: 10, kind: input, shape index: {}]   ;;  %s3313_s11 = inlined_call_operand.vmem [shape: f32[1,32], index: 11, kind: input, shape index: {}]   ;;  %s3314_s12 = inlined_call_operand.vmem [shape: f32[1,32], index: 12, kind: input, shape index: {}]   ;;  %s3315_s13 = inlined_call_operand.vmem [shape: f32[1,32], index: 13, kind: input, shape index: {}]   ;;  %s3316_s14 = inlined_call_operand.hbm [shape: f32[2,16,32], index: 14, kind: output, shape index: {}]  }
   0x1   :  { %3325 = sst [smem:[#allocation21_spill]] %s3305_s3 }
   0x2   :  { %3326 = sst [smem:[#allocation22_spill]] %s3306_s4 }
   0x3   :  { %3327 = sst [smem:[#allocation23_spill]] %s3310_s8 }
   0x4   :  { %3328 = sst [smem:[#allocation24_spill]] %s3316_s14 }
   0x5   :  { %19 = vsyncpa [#allocation5], 0 }
   0x6   :  { %21 = vsyncpa [#allocation5 + $0x1], 0 }
   0x7   :  { %22 = vsyncpa [#allocation8], 0 }
   0x8   :  { %23 = vsyncpa [#allocation11], 0 }
   0x9   :  { %24 = vsyncpa [#allocation6], 0 }
   0xa   :  { %26 = vsyncpa [#allocation6 + $0x1], 0  ;;  %s2822_s29 = smov 0   ;;  %s2824_s30 = smov 0  }
   0xb   :  { %s2826_s15 = smov 0   ;;  %s2828_s16 = smov 0  }
   0xc LB: > { %3329 = sst [smem:[#allocation17_spill]] %s2713_s29  ;;  %s2843_s17 = sadd.s32 4294967295, %s2725_s16   ;;  %s2725_s16 = sphi %s2828_s16, %s3359_s16   ;;  %s2721_s15 = sphi %s2826_s15, %s3356_s15   ;;  %s2717_s30 = sphi %s2824_s30, %s3358_s30   ;;  %s2713_s29 = sphi %s2822_s29, %s3357_s29  }
   0xd   : > { %3330 = sst [smem:[#allocation18_spill]] %s2721_s15  ;;  %s2147_s18 = sadd.s32 4294967294, %s2725_s16  }
   0xe   : > { %p104_p0 = scmp.ne.s32.totalorder %s2717_s30, %s2713_s29  ;;  %p3319_p1 = scmp.eq.s32.totalorder %s2843_s17, 0 }
   0xf   : > { %p365_p3 = scmp.eq.s32.totalorder %s2147_s18, 1  ;;  %p2148_p5 = scmp.ge.s32.totalorder %s2725_s16, 1 }
  0x10   : > { %p2852_p4 = por %p3319_p1, %p104_p0  ;;  %p372_p7 = scmp.lt.s32.totalorder %s2725_s16, 3 }
  0x11   : > { %p2857_p6 = por %p365_p3, %p104_p0  ;;  %s2731_s22 = smov [#allocation7]  }
  0x12   : > { %s3331_s19 = scalar_select %p2852_p4, 1, 0 }
  0x13   : > { %s3332_s20 = scalar_select %p2857_p6, 1, 0 }
  0x14   : > { %p2862_p8 = pnand %p2148_p5, %p372_p7  ;;  %s384_s23 = sshll.u32 %s2731_s22, 4  ;;  %s385_s23 = int_to_ptr.vmem [resolvable:$true] %s384_s23 }
  0x15   : > { %3333 = sst [smem:[#allocation19_spill]] %s3332_s20  ;;  %s2732_s25 = smov [#allocation9]  }
  0x16   : > { %s3334_s21 = scalar_select %p2862_p8, 1, 0 }
  0x17   : > { %p2443_p9 = pneg %p2862_p8  ;;  %s397_s26 = sshll.u32 %s2732_s25, 4  ;;  %s398_s26 = int_to_ptr.vmem [resolvable:$true] %s397_s26 }
  0x18   : > { %s2733_s27 = smov [#allocation10]   ;;  %s2554_s18 = scalar_lea.vmem %s385_s23, 384 }
  0x19   : > { %p2871_p11 = pnand %p2443_p9, %p3319_p1  ;;  %s419_s28 = sshll.u32 %s2733_s27, 4  ;;  %s420_s28 = int_to_ptr.vmem [resolvable:$true] %s419_s28 }
  0x1a   : > { %p2555_p13 = scmp.ne.s32.totalorder %s385_s23, %s2554_s18  ;;  %p2562_p5 = scmp.lt.s32.totalorder %s385_s23, %s385_s23 }
  0x1b   : > { %p2545_p12 = pneg %p2871_p11  ;;  %p2563_p7 = scmp.lt.s32.totalorder %s2554_s18, %s2554_s18 }
  0x1d   : > { %p2557_p0 = pnand %p2555_p13, %p2545_p12  ;;  %p2564_p9 = por %p2563_p7, %p2562_p5 }
  0x1f   : > { %p2558_p3 = pneg %p2557_p0 }
  0x21   : > { %p2565_p10 = pnand %p2564_p9, %p2558_p3 }
  0x23   : > { %2568 = shalt.err (!%p2565_p10)
}
  0x24   : > { %s2734_s22 = smov 128   ;;  %s2735_s25 = smov 8  }
  0x25   : > { %s3336_s3 = sld [smem:[#allocation21_spill]]  ;;  %s2580_s29 = scalar_lea.vmem %s398_s26, 512 }
  0x26   : > { %p2581_p1 = scmp.ne.s32.totalorder %s398_s26, %s2580_s29  ;;  %p2588_p2 = scmp.lt.s32.totalorder %s398_s26, %s398_s26 }
  0x27   : > { %p2589_p6 = scmp.lt.s32.totalorder %s2580_s29, %s2580_s29 }
  0x28   : > { %p2583_p13 = pnand %p2581_p1, %p2545_p12 }
  0x29   : > { %p2590_p5 = por %p2589_p6, %p2588_p2 }
  0x2a   : > { %p2584_p0 = pneg %p2583_p13 }
  0x2b   : > { %2446 = dma.hbm_to_vmem [thread:$0]  (!%p2871_p11), %s3336_s3, 384, %s385_s23, [#allocation8], %s2734_s22, %s2734_s22, %s2735_s25  }
  0x2c   : > { %p2591_p3 = pnand %p2590_p5, %p2584_p0 }
  0x2e   : > { %2594 = shalt.err (!%p2591_p3)
}
  0x2f   : > { %s3337_s4 = sld [smem:[#allocation22_spill]]  ;;  %s2606_s20 = scalar_lea.vmem %s420_s28, 512 }
  0x30   : > { %p2607_p10 = scmp.ne.s32.totalorder %s420_s28, %s2606_s20  ;;  %p2614_p9 = scmp.lt.s32.totalorder %s420_s28, %s420_s28 }
  0x31   : > { %p2615_p13 = scmp.lt.s32.totalorder %s2606_s20, %s2606_s20 }
  0x32   : > { %p2609_p7 = pnand %p2607_p10, %p2545_p12 }
  0x33   : > { %p2616_p4 = por %p2615_p13, %p2614_p9 }
  0x34   : > { %p2610_p1 = pneg %p2609_p7 }
  0x35   : > { %2449 = dma.hbm_to_vmem [thread:$0]  (!%p2871_p11), %s3337_s4, 512, %s398_s26, [#allocation8], %s2734_s22, %s2734_s22, %s2735_s25  }
  0x36   : > { %p2617_p2 = pnand %p2616_p4, %p2610_p1 }
  0x38   : > { %2620 = shalt.err (!%p2617_p2)
}
  0x39   : > { %s3338_s8 = sld [smem:[#allocation23_spill]]  ;;  %s2902_s14 = sadd.s32 1, %s2725_s16  }
  0x3a   : > { %s88_s26 = ssub.s32 %s2725_s16, %s2902_s14  ;;  %s91_s24 = sadd.s32 1, %s2721_s15 }
  0x3b   : > { %p89_p4 = scmp.eq.s32.totalorder %s88_s26, 0  ;;  %p98_p6 = scmp.ne.s32.totalorder %s2721_s15, %s2717_s30 }
  0x3c   : > { %p99_p12 = scmp.eq.s32.totalorder %s2725_s16, 0  ;;  %p2464_p0 = scmp.lt.s32.totalorder %s2725_s16, 2 }
  0x3d   : > { %s2912_s27 = scalar_select %p89_p4, %s2721_s15, %s91_s24  }
  0x3e   : > { %p100_p5 = por %p99_p12, %p98_p6  ;;  %p3340_p3 = scmp.eq.s32.totalorder %s2843_s17, 1 }
  0x3f   : > { %2452 = dma.hbm_to_vmem [thread:$0]  (!%p2871_p11), %s3338_s8, 512, %s420_s28, [#allocation11], %s2734_s22, %s2734_s22, %s2735_s25  }
  0x40   : > { %3339 = sst [smem:[#allocation20_spill]] %s2912_s27  ;;  %p2916_p10 = por %p3340_p3, %p98_p6 }
  0x41   : > { %s464_s20 = sand.u32 1, %s2721_s15   ;;  %s2208_s29 = sshll.u32 %s2725_s16, 6 }
  0x42   : > { %s3341_s18 = scalar_select %p2916_p10, 1, 0 }
  0x43   : > { %s2153_s28 = sshll.u32 %s464_s20, 2  ;;  %s2925_s23 = scalar_lea.hbm %s3304_s2, %s2208_s29 }
  0x44   : > { %s468_s26 = scalar_lea.vmem [#allocation4], %s2153_s28  ;;  %p2927_p11 = pnand %p2464_p0, %p100_p5 }
  0x45   : > { %s475_s24 = sshll.u32 %s468_s26, 4  ;;  %s2933_s4 = scalar_lea.sflag [#allocation5], %s464_s20  ;;  %s2931_s24 = int_to_ptr.vmem [resolvable:$true] %s475_s24 }
  0x46   : > { %s2621_s8 = scalar_lea.hbm %s2925_s23, 64  ;;  %p2623_p1 = pneg %p2927_p11 }
  0x47   : > { %p2622_p7 = scmp.ne.s32.totalorder %s2925_s23, %s2621_s8  ;;  %s2626_s28 = scalar_lea.hbm %s3304_s2, 128 }
  0x48   : > { %p2627_p2 = scmp.lt.s32.totalorder %s2925_s23, %s3304_s2  ;;  %p2628_p4 = scmp.lt.s32.totalorder %s2626_s28, %s2621_s8 }
  0x49   : > { %p2624_p9 = pnand %p2623_p1, %p2622_p7 }
  0x4a   : > { %p2629_p6 = por %p2628_p4, %p2627_p2 }
  0x4b   : > { %p2625_p13 = pneg %p2624_p9 }
  0x4d   : > { %p2630_p12 = pnand %p2629_p6, %p2625_p13 }
  0x4f   : > { %2633 = shalt.err (!%p2630_p12)
}
  0x50   : > { %s2634_s20 = scalar_lea.vmem %s2931_s24, 64  ;;  %s2736_s27 = smov [#allocation4]  }
  0x51   : > { %p2635_p0 = scmp.ne.s32.totalorder %s2931_s24, %s2634_s20  ;;  %s2639_s15 = sshll.u32 %s2736_s27, 4  ;;  %s2640_s15 = int_to_ptr.vmem [resolvable:$false] %s2639_s15 }
  0x52   : > { %s2641_s29 = scalar_lea.vmem %s2640_s15, 128  ;;  %p2642_p7 = scmp.lt.s32.totalorder %s2931_s24, %s2640_s15 }
  0x53   : > { %p2637_p5 = pnand %p2635_p0, %p2623_p1  ;;  %p2643_p9 = scmp.lt.s32.totalorder %s2641_s29, %s2634_s20 }
  0x55   : > { %p2638_p3 = pneg %p2637_p5  ;;  %p2644_p10 = por %p2643_p9, %p2642_p7 }
  0x57   : > { %p2645_p8 = pnand %p2644_p10, %p2638_p3 }
  0x59   : > { %2648 = shalt.err (!%p2645_p8)
}
  0x5a   : > { %s2737_s8 = smov 32   ;;  %s2738_s22 = smov 2  }
  0x5b   : > { %2456 = dma.hbm_to_vmem [thread:$0]  (!%p2927_p11), %s2925_s23, 64, %s2931_s24, %s2933_s4, %s2737_s8, %s2737_s8, %s2738_s22  }
  0x5c   : > { %p3343_p1 = scmp.ne.s32.totalorder %s3334_s21, 0 }
  0x5d   : > { %s2957_s27 = sand.u32 (!%p3343_p1), 1, %s2717_s30   ;;  %p3344_p8 = scmp.ne.s32.totalorder (!%p3343_p1), %s3331_s19, 0 }
  0x5e   : > { %487 = sbr.rel (%p3343_p1) target bundleno = 2391 (0x957), region = 76  ;;  %s2157_s15 = sshll.u32 (!%p3343_p1), %s2957_s27, 2 }
  0x5f   : > { %s490_s28 = scalar_lea.sflag (!%p3343_p1), [#allocation5], %s2957_s27  ;;  %s493_s25 = scalar_lea.vmem (!%p3343_p1), [#allocation4], %s2157_s15 }
  0x63   : > { %2696 = dma.done.wait (%p3344_p8), %s490_s28, 64  }
  0x64   : > { %2698 = vsyncadd (%p3344_p8), %s490_s28, 4294967232  ;;  %p3345_p10 = scmp.eq.s32.totalorder %s2843_s17, 0 }
  0x66   : > { %2700 = dma.done.wait (%p3345_p10), [#allocation8], 896   ;;  %p3346_p11 = pmov %p3345_p10 }
  0x67   : > { %p3347_p13 = pmov %p3345_p10 }
  0x68   : > { %2702 = vsyncadd (%p3346_p11), [#allocation8], 4294966400 }
  0x69   : > { %2704 = dma.done.wait (%p3347_p13), [#allocation11], 512   ;;  %p3348_p2 = pmov %p3345_p10 }
  0x6a   : > { %s2161_s3 = sshll.u32 %s2957_s27, 4  ;;  %p560_p4 = scmp.lt.s32.totalorder %s2843_s17, 1  ;;  %v2213_v0 = vld [vmem:[%s493_s25] sm:$0xf]   ;;  %v580_v1 = vld [vmem:[#allocation7 + $0x10] sm:$0xff]  ;;  %v579_v2 = vld [vmem:[#allocation7 + $0x8] sm:$0xff] }
  0x6b   : > { %2706 = vsyncadd (%p3348_p2), [#allocation11], 4294966784  ;;  %v2214_v3 = vunpack.c.0.s8 %v2213_v0  ;;  %v2215_v4 = vunpack.c.1.s8 %v2213_v0  ;;  %2281 = vmatprep.subr.mxu0 %v580_v1  ;;  %2421 = vmatprep.subr.mxu1 %v580_v1  ;;  %vm728_vm0 = vcmask 130048   ;;  %v578_v5 = vld [vmem:[#allocation7] sm:$0xff]  ;;  %vm581_vm3 = vcmask 195584   ;;  %s3038_s22 = scalar_lea.vmem [#allocation12], %s2161_s3 }
  0x6c   : > { %s561_s4 = scalar_select %p560_p4, %s2843_s17, 1  ;;  %2282 = vmatpush3.msra.mxu0 %v580_v1  ;;  %2424 = vmatpush3.msra.mxu1 %v580_v1  ;;  %v2739_v6 = vmov 0.0   ;;  %vm711_vm4 = vcmask 64512  }
  0x6d   : > { %vm724_vm1 = vcmp.eq.s32.totalorder %v2214_v3, 0  ;;  %vm725_vm2 = vcmp.eq.s32.totalorder %v2215_v4, 0  ;;  %2283 = vmatprep.subr.mxu0 %v579_v2  ;;  %2422 = vmatprep.subr.mxu1 %v579_v2  ;;  %s3040_s15 = smov 0  }
  0x6e   : > { %s2210_s19 = sshll.u32 %s561_s4, 4  ;;  %s2209_s21 = sshll.u32 %s561_s4, 6  ;;  %v726_v7 = vsel %vm724_vm1, -1.767767e+19, %v2739_v6  ;;  %v727_v8 = vsel %vm725_vm2, -1.767767e+19, %v2739_v6  ;;  %2284 = vmatpush3.msra.mxu0 %v579_v2  ;;  %2425 = vmatpush3.msra.mxu1 %v579_v2 }
  0x6f   : > { %s2979_s26 = scalar_lea.vmem %s3303_s1, %s2210_s19  ;;  %s2984_s8 = scalar_lea.vmem %s3302_s0, %s2209_s21  ;;  %729 = vst.msk [vmem:[#allocation3] sm:$0xff] %vm728_vm0, %v726_v7  ;;  %730 = vst.msk [vmem:[#allocation3 + $0x8] sm:$0xff] %vm728_vm0, %v727_v8  ;;  %2285 = vmatprep.subr.mxu0 %v578_v5  ;;  %2423 = vmatprep.subr.mxu1 %v578_v5 }
  0x70   : > { %v570_v9 = vld [vmem:[%s2984_s8] sm:$0xff]  ;;  %v571_v11 = vld [vmem:[%s2984_s8 + $0x8] sm:$0xff]  ;;  %2286 = vmatpush3.msra.mxu0 %v578_v5  ;;  %2426 = vmatpush3.msra.mxu1 %v578_v5  ;;  %v572_v13 = vld [vmem:[%s2984_s8 + $0x10] sm:$0xff] }
  0x71   : > { %v574_v10 = vld [vmem:[%s2984_s8 + $0x20] sm:$0xff]  ;;  %v575_v12 = vld [vmem:[%s2984_s8 + $0x28] sm:$0xff]  ;;  %v576_v14 = vld [vmem:[%s2984_s8 + $0x30] sm:$0xff]  ;;  %2287 = vmatprep.mubr.msk.f32.mxu0 %vm581_vm3, %v570_v9 }
  0x72   : > { %2293 = vmatprep.mubr.msk.f32.mxu1 %vm581_vm3, %v574_v10  ;;  %2288 = vmatmul.mubr.msk.f32.vlgmr.msra.gmra.mxu0 %vm581_vm3, %v571_v11  ;;  %v573_v15 = vld [vmem:[%s2984_s8 + $0x18] sm:$0xff] }
  0x73   : > { %2294 = vmatmul.mubr.msk.f32.vlgmr.msra.gmra.mxu1 %vm581_vm3, %v575_v12  ;;  %2290 = vmatprep.mubr.msk.f32.mxu0 %vm581_vm3, %v572_v13  ;;  %v577_v16 = vld [vmem:[%s2984_s8 + $0x38] sm:$0xff] }
  0x74   : > { %2296 = vmatprep.mubr.msk.f32.mxu1 %vm581_vm3, %v576_v14 }
  0x76   : > { %2291 = vmatmul.mubr.msk.f32.gmra.mxu0 %vm581_vm3, %v573_v15 }
  0x77   : > { %2297 = vmatmul.mubr.msk.f32.gmra.mxu1 %vm581_vm3, %v577_v16 }
 0x132   : > { %v3004_v17 = vpop.f32.mrf.mxu0 }
 0x133   : > { %v3006_v18 = vpop.f32.mrf.mxu1  ;;  %713 = vst.msk [vmem:[#allocation2 + $0x8] sm:$0xff] %vm711_vm4, %v3004_v17 }
 0x134   : > { %717 = vst.msk [vmem:[#allocation2 + $0x28] sm:$0xff] %vm711_vm4, %v3006_v18  ;;  %v3012_v19 = vpop.f32.mrf.mxu0 }
 0x135   : > { %v3014_v20 = vpop.f32.mrf.mxu1  ;;  %712 = vst.msk [vmem:[#allocation2] sm:$0xff] %vm711_vm4, %v3012_v19 }
 0x136   : > { %716 = vst.msk [vmem:[#allocation2 + $0x20] sm:$0xff] %vm711_vm4, %v3014_v20  ;;  %v3020_v21 = vpop.f32.mrf.mxu0 }
 0x137   : > { %v3022_v22 = vpop.f32.mrf.mxu1  ;;  %715 = vst.msk [vmem:[#allocation2 + $0x18] sm:$0xff] %vm711_vm4, %v3020_v21 }
 0x138   : > { %719 = vst.msk [vmem:[#allocation2 + $0x38] sm:$0xff] %vm711_vm4, %v3022_v22  ;;  %v3028_v23 = vpop.f32.mrf.mxu0 }
 0x139   : > { %v3030_v24 = vpop.f32.mrf.mxu1  ;;  %714 = vst.msk [vmem:[#allocation2 + $0x10] sm:$0xff] %vm711_vm4, %v3028_v23 }
 0x13a   : > { %718 = vst.msk [vmem:[#allocation2 + $0x30] sm:$0xff] %vm711_vm4, %v3030_v24 }
 0x13b LB: >> { %s2740_s28 = smov 120   ;;  %v2741_v25 = vmov 0.0   ;;  %vm2742_vm5 = vmmov 0   ;;  %s3060_s25 = sshll.u32 %s2729_s15, 3  ;;  %vm1753_vm6 = vcmask 261120   ;;  %s2729_s15 = sphi %s3040_s15, %s736_s15  }
 0x13c   : >> { %747 = vrot.lane.b32.xlu0 %v3004_v17, %s2740_s28  ;;  %830 = vrot.lane.b32.xlu1 %v3020_v21, %s2740_s28  ;;  %s738_s3 = scalar_lea.vmem [#allocation2], %s3060_s25  ;;  %s1075_s4 = scalar_lea.vmem [#allocation3], %s3060_s25 }
 0x13d   : >> { %2299 = vmatprep.subr.mxu0 %v2741_v25  ;;  %2303 = vmatprep.mubr.msk.f32.mxu0 %vm2742_vm5, %v2741_v25  ;;  %v1076_v38 = vld [vmem:[%s1075_s4] sm:$0xff]  ;;  %s2743_s19 = smov 112   ;;  %s1750_s21 = scalar_lea.vmem %s2979_s26, %s3060_s25 }
 0x13e   : >> { %2320 = vmatprep.subr.mxu1 %v2741_v25  ;;  %2324 = vmatprep.mubr.msk.f32.mxu1 %vm2742_vm5, %v2741_v25  ;;  %s736_s15 = sadd.s32 1, %s2729_s15  }
 0x13f   : >> { %p733_p6 = scmp.ge.s32.totalorder %s736_s15, 2  }
 0x140   : >> { %745 = vrot.lane.b32.xlu0 %v3012_v19, %s2740_s28  ;;  %828 = vrot.lane.b32.xlu1 %v3028_v23, %s2740_s28  ;;  %s2211_s4 = sshll.u32 (%p733_p6), %s2843_s17, 8  ;;  %s3349_s23 = sld [smem:[#allocation24_spill]] (%p733_p6) }
 0x141   : >> { %v739_v30 = vld [vmem:[%s738_s3] sm:$0xff]  ;;  %v740_v34 = vld [vmem:[%s738_s3 + $0x10] sm:$0xff]  ;;  %s1995_s20 = scalar_lea.sflag (%p733_p6), [#allocation6], %s2957_s27  ;;  %p3350_p0 = scmp.ne.s32.totalorder (%p733_p6), %s3341_s18, 0 }
 0x142   : >> { %v742_v35 = vld [vmem:[%s738_s3 + $0x30] sm:$0xff]  ;;  %v741_v37 = vld [vmem:[%s738_s3 + $0x20] sm:$0xff]  ;;  %s1992_s3 = scalar_lea.vmem %s3038_s22, %s3060_s25 [#allocation12]  ;;  %s2008_s25 = sshll.u32 (%p733_p6), %s3038_s22, 4  ;;  %s3259_s25 = int_to_ptr.vmem [resolvable:$true] %s2008_s25 }
 0x143   : > { %s2649_s29 = scalar_lea.vmem (%p733_p6), %s3259_s25, 256  ;;  %s2744_s26 = smov (%p733_p6), [#allocation12]  }
 0x144   : >> { %913 = vrot.lane.b32.xlu0 %v3006_v18, %s2740_s28  ;;  %996 = vrot.lane.b32.xlu1 %v3022_v22, %s2740_s28  ;;  %p2650_p12 = scmp.ne.s32.totalorder (%p733_p6), %s3259_s25, %s2649_s29  ;;  %s2653_s15 = sshll.u32 (%p733_p6), %s2744_s26, 4  ;;  %s2654_s15 = int_to_ptr.vmem [resolvable:$false] %s2653_s15 }
 0x145   : > { %s2655_s17 = scalar_lea.vmem (%p733_p6), %s2654_s15, 512  ;;  %p2656_p7 = scmp.lt.s32.totalorder (%p733_p6), %s3259_s25, %s2654_s15 }
 0x146   : > { %s3256_s24 = scalar_lea.hbm (%p733_p6), %s3349_s23, %s2211_s4  ;;  %p2651_p5 = pnand (%p733_p6), %p2650_p12, %p3350_p0 }
 0x147   : > { %p2657_p9 = scmp.lt.s32.totalorder (%p733_p6), %s2655_s17, %s2649_s29 }
 0x148   : >> { %911 = vrot.lane.b32.xlu0 %v3014_v20, %s2740_s28  ;;  %994 = vrot.lane.b32.xlu1 %v3030_v24, %s2740_s28  ;;  %p2652_p3 = pneg (%p733_p6), %p2651_p5 }
 0x149   : > { %p2658_p1 = por (%p733_p6), %p2657_p9, %p2656_p7 }
 0x14b   : > { %p2659_p8 = pnand (%p733_p6), %p2658_p1, %p2652_p3 }
 0x1ae   : >> { %v748_v26 = vpop.permute.xlu0 %747  ;;  %v831_v27 = vpop.permute.xlu1 %830 }
 0x1af   : >> { %2300 = vmatpush3.xpose.msk.msra.mxu0 %vm711_vm4, %v748_v26 }
 0x1b0   : >> { %2301 = vmatprep.subr.mxu0 %v2741_v25 }
 0x1b2   : >> { %v746_v28 = vpop.permute.xlu0 %745  ;;  %v829_v29 = vpop.permute.xlu1 %828 }
 0x1b3   : >> { %2302 = vmatpush3.xpose.msk.msra.mxu0 %vm711_vm4, %v746_v28 }
 0x1b4   : >> { %2306 = vmatprep.subr.mxu0 %v2741_v25 }
 0x1b6   : >> { %2304 = vmatmul.mubr.msk.f32.vlgmr.msra.gmra.mxu0 %vm711_vm4, %v739_v30  ;;  %v997_v31 = vpop.permute.xlu1 %996  ;;  %v914_v32 = vpop.permute.xlu0 %913 }
 0x1b7   : >> { %2307 = vmatpush3.xpose.msk.msra.mxu0 %vm711_vm4, %v831_v27  ;;  %2310 = vmatprep.mubr.msk.f32.mxu0 %vm2742_vm5, %v2741_v25 }
 0x1b8   : >> { %2308 = vmatprep.subr.mxu0 %v2741_v25  ;;  %2321 = vmatpush3.xpose.msk.msra.mxu1 %vm711_vm4, %v997_v31 }
 0x1b9   : >> { %2322 = vmatprep.subr.mxu1 %v2741_v25 }
 0x1ba   : >> { %v995_v33 = vpop.permute.xlu1 %994  ;;  %v912_v36 = vpop.permute.xlu0 %911 }
 0x1bb   : >> { %2309 = vmatpush3.xpose.msk.msra.mxu0 %vm711_vm4, %v829_v29 }
 0x1bc   : >> { %2313 = vmatprep.subr.mxu0 %v2741_v25  ;;  %2323 = vmatpush3.xpose.msk.msra.mxu1 %vm711_vm4, %v995_v33 }
 0x1bd   : >> { %2348 = vmatprep.subr.mxu1 %v2741_v25 }
 0x1be   : >> { %2311 = vmatmul.mubr.msk.f32.vlgmr.msra.gmra.mxu0 %vm711_vm4, %v740_v34 }
 0x1bf   : >> { %2314 = vmatpush3.xpose.msk.msra.mxu0 %vm711_vm4, %v914_v32  ;;  %2317 = vmatprep.mubr.msk.f32.mxu0 %vm2742_vm5, %v2741_v25 }
 0x1c0   : >> { %2315 = vmatprep.subr.mxu0 %v2741_v25  ;;  %2325 = vmatmul.mubr.msk.f32.vlgmr.msra.gmra.mxu1 %vm711_vm4, %v742_v35 }
 0x1c1   : >> { %2352 = vmatprep.mubr.msk.f32.mxu1 %vm2742_vm5, %v2741_v25 }
 0x1c3   : >> { %2316 = vmatpush3.xpose.msk.msra.mxu0 %vm711_vm4, %v912_v36 }
 0x1c4   : >> { %2327 = vmatprep.subr.mxu0 %v2741_v25 }
 0x1c6   : >> { %2318 = vmatmul.mubr.msk.f32.vlgmr.msra.gmra.mxu0 %vm711_vm4, %v741_v37 }
 0x1c7   : >> { %2331 = vmatprep.mubr.msk.f32.mxu0 %vm2742_vm5, %v2741_v25 }
 0x276   : >> { %v822_v39 = vpop.f32.mrf.mxu0 }
 0x277   : >> { %v1077_v40 = vadd.f32 %v1076_v38, %v822_v39 }
 0x278   : >> { %v2305_v41 = vpop.f32.mrf.mxu0 }
 0x279   : >> { %v1081_v42 = vsel %vm728_vm0, %v1077_v40, -inf  ;;  %v1443_v41 = vld [vmem:[#allocation9 + $0x8] sm:$0xff] }
 0x27a   : >> { %1082 = vmax.xlane.f32.xlu0 %v1081_v42  ;;  %v1667_v42 = vld [vmem:[#allocation9 + $0x18] sm:$0xff] }
 0x27e   : >> { %v905_v43 = vpop.f32.mrf.mxu0 }
 0x27f   : >> { %v1078_v44 = vadd.f32 %v1076_v38, %v905_v43 }
 0x280   : >> { %v2312_v45 = vpop.f32.mrf.mxu0  ;;  %v1071_v46 = vpop.f32.mrf.mxu1 }
 0x281   : >> { %v1084_v47 = vsel %vm728_vm0, %v1078_v44, -inf  ;;  %v1080_v51 = vadd.f32 %v1076_v38, %v1071_v46 }
 0x282   : >> { %1085 = vmax.xlane.f32.xlu1 %v1084_v47  ;;  %v2326_v48 = vpop.f32.mrf.mxu1  ;;  %v1591_v47 = vld [vmem:[#allocation9 + $0x10] sm:$0xff] }
 0x283   : >> { %v1090_v54 = vsel %vm728_vm0, %v1080_v51, -inf }
 0x286   : >> { %v988_v49 = vpop.f32.mrf.mxu0 }
 0x287   : >> { %v1079_v50 = vadd.f32 %v1076_v38, %v988_v49 }
 0x288   : >> { %v2319_v52 = vpop.f32.mrf.mxu0 }
 0x289   : >> { %v1087_v53 = vsel %vm728_vm0, %v1079_v50, -inf }
 0x28a   : >> { %1088 = vmax.xlane.f32.xlu0 %v1087_v53 }
 0x28e   : >> { %1091 = vmax.xlane.f32.xlu0 %v1090_v54 }
 0x293   : >> { %1127 = vrot.lane.b32.xlu1 %v3004_v17, %s2743_s19 }
 0x297   : >> { %1206 = vrot.lane.b32.xlu1 %v3020_v21, %s2743_s19 }
 0x29b   : >> { %1204 = vrot.lane.b32.xlu1 %v3028_v23, %s2743_s19 }
 0x29f   : >> { %1283 = vrot.lane.b32.xlu1 %v3014_v20, %s2743_s19 }
 0x2a4   : >> { %1125 = vrot.lane.b32.xlu0 %v3012_v19, %s2743_s19 }
 0x2a8   : >> { %1285 = vrot.lane.b32.xlu0 %v3006_v18, %s2743_s19 }
 0x303   : >> { %v1083_v55 = vpop.xlane.xlu0 %1082 }
 0x304   : >> { %v1093_v56 = vsub.f32 %v1077_v40, %v1083_v55  ;;  %v1441_v40 = vld [vmem:[#allocation9] sm:$0xff] }
 0x306   : >> { %v1097_v57 = vmul.f32 1.442695, %v1093_v56 }
 0x308   : >> { %2523 = vpow2.f32 %v1097_v57 }
 0x30b   : >> { %v1086_v58 = vpop.xlane.xlu1 %1085 }
 0x30c   : >> { %v1094_v63 = vsub.f32 %v1078_v44, %v1086_v58 }
 0x30e   : >> { %v1099_v4 = vmul.f32 1.442695, %v1094_v63 }
 0x30f   : >> { %v1128_v59 = vpop.permute.xlu1 %1127 }
 0x310   : >> { %2328 = vmatpush3.msra.mxu0 %v1128_v59 }
 0x311   : >> { %2329 = vmatprep.subr.mxu0 %v2741_v25 }
 0x313   : >> { %v1089_v60 = vpop.xlane.xlu0 %1088  ;;  %v1207_v13 = vpop.permute.xlu1 %1206 }
 0x314   : >> { %v1095_v61 = vsub.f32 %v1079_v50, %v1089_v60 }
 0x315   : >> { %v2524_v62 = vpop.eup %2523 }
 0x316   : >> { %v1101_v0 = vmul.f32 1.442695, %v1095_v61  ;;  %v1105_v1 = vsel %vm728_vm0, %v2524_v62, 0.0 }
 0x317   : >> { %1106 = vadd.xlane.f32.xlu1 %v1105_v1  ;;  %v1092_v2 = vpop.xlane.xlu0 %1091  ;;  %v1205_v14 = vpop.permute.xlu1 %1204 }
 0x318   : >> { %2525 = vpow2.f32 %v1101_v0  ;;  %v1096_v3 = vsub.f32 %v1080_v51, %v1092_v2  ;;  %v1751_v0 = vld [vmem:[%s1750_s21] sm:$0xff] }
 0x31a   : >> { %v1103_v5 = vmul.f32 1.442695, %v1096_v3 }
 0x31b   : >> { %v1126_v6 = vpop.permute.xlu0 %1125  ;;  %v1284_v15 = vpop.permute.xlu1 %1283 }
 0x31c   : >> { %2527 = vpow2.f32 %v1103_v5  ;;  %2330 = vmatpush3.msra.mxu0 %v1126_v6 }
 0x31d   : >> { %2334 = vmatprep.subr.mxu0 %v2741_v25  ;;  %2529 = vpow2.f32 %v1099_v4 }
 0x31f   : >> { %v1286_v28 = vpop.permute.xlu0 %1285 }
 0x325   : >> { %v2526_v7 = vpop.eup %2525 }
 0x326   : >> { %v1111_v8 = vsel %vm728_vm0, %v2526_v7, 0.0 }
 0x327   : >> { %1112 = vadd.xlane.f32.xlu1 %v1111_v8 }
 0x329   : >> { %v2528_v9 = vpop.eup %2527 }
 0x32a   : >> { %v1114_v10 = vsel %vm728_vm0, %v2528_v9, 0.0  ;;  %v2530_v11 = vpop.eup %2529 }
 0x32b   : >> { %1115 = vadd.xlane.f32.xlu0 %v1114_v10  ;;  %v1108_v12 = vsel %vm728_vm0, %v2530_v11, 0.0  ;;  %v1786_v10 = vld [vmem:[#allocation10 + $0x10] sm:$0xff] }
 0x32f   : >> { %1109 = vadd.xlane.f32.xlu0 %v1108_v12  ;;  %v1784_v12 = vld [vmem:[#allocation10] sm:$0xff] }
 0x338   : >> { %1362 = vrot.lane.b32.xlu1 %v3030_v24, %s2743_s19 }
 0x345   : >> { %1364 = vrot.lane.b32.xlu0 %v3022_v22, %s2743_s19 }
 0x3a0   : >> { %v1107_v16 = vpop.xlane.xlu1 %1106 }
 0x3a1   : >> { %2531 = vrcp.f32 %v1107_v16  ;;  %v1881_v16 = vld [vmem:[%s3312_s10 + $0x60] sm:$0xff] }
 0x3ae   : >> { %v2532_v26 = vpop.eup %2531 }
 0x3af   : >> { %v1118_v27 = vmul.f32 %v2532_v26, %v2524_v62  ;;  %v2195_v62 = vld [vmem:[%s3307_s5] ss:$0 sm:$0xff]  ;;  %v1880_v26 = vld [vmem:[%s3312_s10 + $0x58] sm:$0xff] }
 0x3b0   : >> { %v1113_v30 = vpop.xlane.xlu1 %1112 }
 0x3b1   : >> { %2332 = vmatmul.mubr.msk.f32.vlgmr.msra.gmra.mxu0 %vm728_vm0, %v1118_v27  ;;  %v1879_v27 = vld [vmem:[%s3312_s10 + $0x50] sm:$0xff] }
 0x3b2   : >> { %2335 = vmatpush3.msra.mxu0 %v1207_v13  ;;  %2338 = vmatprep.mubr.msk.f32.mxu0 %vm2742_vm5, %v2741_v25  ;;  %v1884_v13 = vld [vmem:[%s3312_s10 + $0x78] sm:$0xff] }
 0x3b3   : >> { %2336 = vmatprep.subr.mxu0 %v2741_v25 }
 0x3b4   : >> { %2337 = vmatpush3.msra.mxu0 %v1205_v14  ;;  %v1116_v29 = vpop.xlane.xlu0 %1115  ;;  %v1363_v33 = vpop.permute.xlu1 %1362  ;;  %v1883_v14 = vld [vmem:[%s3312_s10 + $0x70] sm:$0xff] }
 0x3b5   : >> { %2533 = vrcp.f32 %v1116_v29  ;;  %2341 = vmatprep.subr.mxu0 %v2741_v25  ;;  %v1877_v29 = vld [vmem:[%s3312_s10 + $0x40] sm:$0xff] }
 0x3b8   : >> { %v1110_v31 = vpop.xlane.xlu0 %1109 }
 0x3b9   : >> { %2535 = vrcp.f32 %v1110_v31  ;;  %v1875_v31 = vld [vmem:[%s3312_s10 + $0x30] sm:$0xff] }
 0x3ba   : >> { %2537 = vrcp.f32 %v1113_v30  ;;  %v1876_v30 = vld [vmem:[%s3312_s10 + $0x38] sm:$0xff] }
 0x3bc   : >> { %v1365_v32 = vpop.permute.xlu0 %1364 }
 0x3bd   : >> { %2349 = vmatpush3.msra.mxu1 %v1365_v32  ;;  %v1874_v32 = vld [vmem:[%s3312_s10 + $0x28] sm:$0xff] }
 0x3be   : >> { %2350 = vmatprep.subr.mxu1 %v2741_v25 }
 0x3bf   : >> { %2351 = vmatpush3.msra.mxu1 %v1363_v33  ;;  %v1873_v33 = vld [vmem:[%s3312_s10 + $0x20] sm:$0xff] }
 0x3c0   : >> { %2360 = vmatprep.subr.mxu1 %v2741_v25 }
 0x3c2   : >> { %v2534_v34 = vpop.eup %2533 }
 0x3c3   : >> { %v1124_v35 = vmul.f32 %v2534_v34, %v2528_v9  ;;  %v1787_v9 = vld [vmem:[#allocation10 + $0x18] sm:$0xff]  ;;  %v1872_v34 = vld [vmem:[%s3312_s10 + $0x18] sm:$0xff] }
 0x3c5   : >> { %2353 = vmatmul.mubr.msk.f32.vlgmr.msra.gmra.mxu1 %vm728_vm0, %v1124_v35 }
 0x3c6   : >> { %v2536_v36 = vpop.eup %2535  ;;  %2362 = vmatprep.mubr.msk.f32.mxu1 %vm2742_vm5, %v2741_v25  ;;  %2361 = vmatpush3.msra.mxu1 %v1441_v40 }
 0x3c7   : >> { %v1120_v37 = vmul.f32 %v2536_v36, %v2530_v11  ;;  %v2538_v38 = vpop.eup %2537  ;;  %2370 = vmatprep.subr.mxu1 %v2741_v25  ;;  %v1785_v11 = vld [vmem:[#allocation10 + $0x8] sm:$0xff] }
 0x3c8   : >> { %v1122_v39 = vmul.f32 %v2538_v38, %v2526_v7 }
 0x3c9   : >> { %2339 = vmatmul.mubr.msk.f32.vlgmr.msra.gmra.mxu0 %vm728_vm0, %v1120_v37 }
 0x3ca   : >> { %2342 = vmatpush3.msra.mxu0 %v1286_v28  ;;  %2345 = vmatprep.mubr.msk.f32.mxu0 %vm2742_vm5, %v2741_v25  ;;  %v1878_v28 = vld [vmem:[%s3312_s10 + $0x48] sm:$0xff] }
 0x3cb   : >> { %2343 = vmatprep.subr.mxu0 %v2741_v25 }
 0x3cc   : >> { %2344 = vmatpush3.msra.mxu0 %v1284_v15  ;;  %v1882_v15 = vld [vmem:[%s3312_s10 + $0x68] sm:$0xff] }
 0x3cd   : >> { %2346 = vmatmul.mubr.msk.f32.vlgmr.msra.gmra.mxu0 %vm728_vm0, %v1122_v39  ;;  %2355 = vmatprep.subr.mxu0 %v2741_v25  ;;  %v2196_v39 = vld [vmem:[%s3308_s6] ss:$0 sm:$0xff] }
 0x3ce   : >> { %2357 = vmatprep.mubr.msk.f32.mxu0 %vm2742_vm5, %v2741_v25  ;;  %2356 = vmatpush3.msra.mxu0 %v1443_v41  ;;  %v2197_v41 = vld [vmem:[%s3309_s7] ss:$0 sm:$0xff] }
 0x3cf   : >> { %2365 = vmatprep.subr.mxu0 %v2741_v25 }
 0x471   : >> { %v1200_v43 = vpop.f32.mrf.mxu0 }
 0x472   : >> { %2363 = vmatmul.mubr.msk.f32.vlgmr.msra.gmra.mxu1 %vm711_vm4, %v1200_v43 }
 0x473   : >> { %v2333_v44 = vpop.f32.mrf.mxu0  ;;  %2371 = vmatpush3.msra.mxu1 %v1667_v42  ;;  %2372 = vmatprep.mubr.msk.f32.mxu1 %vm2742_vm5, %v2741_v25 }
 0x474   : >> { %2386 = vmatprep.subr.mxu1 %v2741_v25  ;;  %v1871_v44 = vld [vmem:[%s3312_s10 + $0x10] sm:$0xff] }
 0x485   : >> { %v1437_v45 = vpop.f32.mrf.mxu1 }
 0x486   : >> { %2373 = vmatmul.mubr.msk.f32.vlgmr.msra.gmra.mxu1 %vm711_vm4, %v1437_v45  ;;  %v1870_v45 = vld [vmem:[%s3312_s10 + $0x8] sm:$0xff] }
 0x487   : >> { %v2354_v46 = vpop.f32.mrf.mxu1  ;;  %2418 = vmatprep.mubr.msk.f32.mxu1 %vm2742_vm5, %v2741_v25  ;;  %2387 = vmatpush3.msra.mxu1 %v1884_v13 }
 0x488   : >> { %2388 = vmatprep.subr.mxu1 %v2741_v25  ;;  %v1869_v46 = vld [vmem:[%s3312_s10] sm:$0xff] }
 0x489   : >> { %v1279_v48 = vpop.f32.mrf.mxu0  ;;  %2389 = vmatpush3.msra.mxu1 %v1883_v14 }
 0x48a   : >> { %2358 = vmatmul.mubr.msk.f32.vlgmr.msra.gmra.mxu0 %vm711_vm4, %v1279_v48  ;;  %2390 = vmatprep.subr.mxu1 %v2741_v25 }
 0x48b   : >> { %2366 = vmatpush3.msra.mxu0 %v1591_v47  ;;  %v2340_v49 = vpop.f32.mrf.mxu0  ;;  %2367 = vmatprep.mubr.msk.f32.mxu0 %vm2742_vm5, %v2741_v25  ;;  %v2198_v47 = vld [vmem:[%s3311_s9] ss:$0 sm:$0xff] }
 0x48c   : >> { %2375 = vmatprep.subr.mxu0 %v2741_v25  ;;  %2391 = vmatpush3.msra.mxu1 %v1882_v15 }
 0x48d   : >> { %v1358_v50 = vpop.f32.mrf.mxu0  ;;  %2392 = vmatprep.subr.mxu1 %v2741_v25 }
 0x48e   : >> { %2368 = vmatmul.mubr.msk.f32.vlgmr.msra.gmra.mxu0 %vm711_vm4, %v1358_v50  ;;  %2393 = vmatpush3.msra.mxu1 %v1881_v16 }
 0x48f   : >> { %v2347_v51 = vpop.f32.mrf.mxu0  ;;  %2383 = vmatprep.mubr.msk.f32.mxu0 %vm2742_vm5, %v2741_v25  ;;  %2376 = vmatpush3.msra.mxu0 %v1787_v9 }
 0x490   : >> { %2377 = vmatprep.subr.mxu0 %v2741_v25  ;;  %2394 = vmatprep.subr.mxu1 %v2741_v25 }
 0x491   : >> { %2378 = vmatpush3.msra.mxu0 %v1786_v10  ;;  %2395 = vmatpush3.msra.mxu1 %v1880_v26 }
 0x492   : >> { %2379 = vmatprep.subr.mxu0 %v2741_v25  ;;  %2396 = vmatprep.subr.mxu1 %v2741_v25 }
 0x493   : >> { %2380 = vmatpush3.msra.mxu0 %v1785_v11  ;;  %2397 = vmatpush3.msra.mxu1 %v1879_v27 }
 0x494   : >> { %2381 = vmatprep.subr.mxu0 %v2741_v25  ;;  %2398 = vmatprep.subr.mxu1 %v2741_v25 }
 0x495   : >> { %2382 = vmatpush3.msra.mxu0 %v1784_v12  ;;  %2399 = vmatpush3.msra.mxu1 %v1878_v28 }
 0x496   : >> { %2400 = vmatprep.subr.mxu1 %v2741_v25 }
 0x497   : >> { %2401 = vmatpush3.msra.mxu1 %v1877_v29 }
 0x498   : >> { %2402 = vmatprep.subr.mxu1 %v2741_v25 }
 0x499   : >> { %2403 = vmatpush3.msra.mxu1 %v1876_v30 }
 0x49a   : >> { %2404 = vmatprep.subr.mxu1 %v2741_v25 }
 0x49b   : >> { %2405 = vmatpush3.msra.mxu1 %v1875_v31 }
 0x49c   : >> { %2406 = vmatprep.subr.mxu1 %v2741_v25 }
 0x49d   : >> { %2407 = vmatpush3.msra.mxu1 %v1874_v32 }
 0x49e   : >> { %2408 = vmatprep.subr.mxu1 %v2741_v25 }
 0x49f   : >> { %2409 = vmatpush3.msra.mxu1 %v1873_v33 }
 0x4a0   : >> { %2410 = vmatprep.subr.mxu1 %v2741_v25 }
 0x4a1   : >> { %2411 = vmatpush3.msra.mxu1 %v1872_v34 }
 0x4a2   : >> { %2412 = vmatprep.subr.mxu1 %v2741_v25 }
 0x4a3   : >> { %2413 = vmatpush3.msra.mxu1 %v1871_v44 }
 0x4a4   : >> { %2414 = vmatprep.subr.mxu1 %v2741_v25 }
 0x4a5   : >> { %2415 = vmatpush3.msra.mxu1 %v1870_v45 }
 0x4a6   : >> { %2416 = vmatprep.subr.mxu1 %v2741_v25 }
 0x4a7   : >> { %2417 = vmatpush3.msra.mxu1 %v1869_v46 }
 0x532   : >> { %v1586_v52 = vpop.f32.mrf.mxu1 }
 0x534   : >> { %v2364_v53 = vpop.f32.mrf.mxu1 }
 0x546   : >> { %v1737_v54 = vpop.f32.mrf.mxu1 }
 0x548   : >> { %v2374_v55 = vpop.f32.mrf.mxu1 }
 0x54a   : >> { %v1513_v56 = vpop.f32.mrf.mxu0 }
 0x54b   : >> { %v1587_v58 = vadd.f32 %v1586_v52, %v1513_v56  ;;  %v2200_v52 = vld [vmem:[%s3313_s11] ss:$0 sm:$0xff] }
 0x54c   : >> { %v2359_v57 = vpop.f32.mrf.mxu0 }
 0x54e   : >> { %v1661_v59 = vpop.f32.mrf.mxu0 }
 0x54f   : >> { %v1665_v60 = vadd.f32 %v1661_v59, %v1587_v58 }
 0x550   : >> { %v2369_v61 = vpop.f32.mrf.mxu0 }
 0x551   : >> { %v1741_v63 = vadd.f32 %v1737_v54, %v1665_v60 }
 0x553   : >> { %v1749_v1 = vadd.f32 %v2195_v62, %v1741_v63 }
 0x555   : >> { %v1752_v2 = vadd.f32 %v1751_v0, %v1749_v1 }
 0x557   : >> { %v1754_v3 = vsel %vm1753_vm6, %v1752_v2, 0.0 }
 0x558   : >> { %1755 = vadd.xlane.f32.xlu0 %v1754_v3 }
 0x5e1   : >> { %v1756_v4 = vpop.xlane.xlu0 %1755 }
 0x5e2   : >> { %v1758_v5 = vmul.f32 0.03125, %v1756_v4  ;;  %v2202_v4 = vld [vmem:[%s3315_s13] ss:$0 sm:$0xff] }
 0x5e4   : >> { %v1759_v6 = vsub.f32 %v1752_v2, %v1758_v5  ;;  %v2201_v2 = vld [vmem:[%s3314_s12] ss:$0 sm:$0xff] }
 0x5e6   : >> { %v1760_v7 = vmul.f32 %v1759_v6, %v1759_v6 }
 0x5e8   : >> { %v1761_v8 = vsel %vm1753_vm6, %v1760_v7, 0.0 }
 0x5e9   : >> { %1762 = vadd.xlane.f32.xlu1 %v1761_v8 }
 0x672   : >> { %v1763_v35 = vpop.xlane.xlu1 %1762 }
 0x673   : >> { %v1764_v36 = vmul.f32 0.03125, %v1763_v35 }
 0x675   : >> { %v1765_v37 = vadd.f32 1e-05, %v1764_v36 }
 0x677   : >> { %2539 = vrsqrt.f32 %v1765_v37 }
 0x684   : >> { %v2540_v38 = vpop.eup %2539 }
 0x685   : >> { %v1767_v40 = vmul.f32 %v2540_v38, %v1759_v6 }
 0x687   : >> { %v1775_v42 = vmul.f32 %v2196_v39, %v1767_v40 }
 0x689   : >> { %v1783_v43 = vadd.f32 %v2197_v41, %v1775_v42 }
 0x68b   : >> { %2384 = vmatmul.mubr.msk.f32.vlgmr.msra.gmra.mxu0 %vm1753_vm6, %v1783_v43 }
 0x74b   : >> { %v1864_v48 = vpop.f32.mrf.mxu0 }
 0x74c   : >> { %v1865_v49 = vadd.f32 %v2198_v47, %v1864_v48 }
 0x74d   : >> { %v2385_v50 = vpop.f32.mrf.mxu0 }
 0x74e   : >> { %v1868_v51 = vmax.f32 %v1865_v49, 0.0 }
 0x750   : >> { %2419 = vmatmul.mubr.f32.vlgmr.msra.gmra.mxu1 %v1868_v51 }
 0x810   : >> { %v1958_v53 = vpop.f32.mrf.mxu1 }
 0x811   : >> { %v1959_v54 = vadd.f32 %v2200_v52, %v1958_v53 }
 0x812   : >> { %v2420_v55 = vpop.f32.mrf.mxu1 }
 0x813   : >> { %v1962_v56 = vadd.f32 %v1959_v54, %v1783_v43 }
 0x815   : >> { %v1963_v25 = vsel %vm1753_vm6, %v1962_v56, 0.0 }
 0x816   : >> { %1964 = vadd.xlane.f32.xlu0 %v1963_v25 }
 0x89f   : >> { %v1965_v57 = vpop.xlane.xlu0 %1964 }
 0x8a0   : >> { %v1966_v58 = vmul.f32 0.03125, %v1965_v57 }
 0x8a2   : >> { %v1967_v59 = vsub.f32 %v1962_v56, %v1966_v58 }
 0x8a4   : >> { %v1968_v60 = vmul.f32 %v1967_v59, %v1967_v59 }
 0x8a6   : >> { %v1969_v61 = vsel %vm1753_vm6, %v1968_v60, 0.0 }
 0x8a7   : >> { %1970 = vadd.xlane.f32.xlu0 %v1969_v61 }
 0x930   : >> { %v1971_v62 = vpop.xlane.xlu0 %1970 }
 0x931   : >> { %v1972_v63 = vmul.f32 0.03125, %v1971_v62 }
 0x933   : >> { %v1973_v0 = vadd.f32 1e-05, %v1972_v63 }
 0x935   : >> { %2541 = vrsqrt.f32 %v1973_v0 }
 0x942   : >> { %v2542_v1 = vpop.eup %2541 }
 0x943   : >> { %v1975_v3 = vmul.f32 %v2542_v1, %v1967_v59 }
 0x945   : >> { %v1983_v5 = vmul.f32 %v2201_v2, %v1975_v3  ;;  %735 = sbr.rel (!%p733_p6) target bundleno = 315 (0x13b), region = 153 }
 0x947   : >> { %v1991_v6 = vadd.f32 %v2202_v4, %v1983_v5 }
 0x949   : >> { %1993 = vst.msk [vmem:[%s1992_s3] sm:$0xff] %vm1753_vm6, %v1991_v6 }
 0x94a   : > { %2662 = shalt.err (!%p2659_p8)
}
 0x94b   : > { %s2663_s22 = scalar_lea.hbm %s3256_s24, 256  ;;  %s2667_s3 = scalar_lea.hbm %s3349_s23, 512 }
 0x94c   : > { %p2664_p10 = scmp.ne.s32.totalorder %s3256_s24, %s2663_s22  ;;  %p2668_p2 = scmp.lt.s32.totalorder %s3256_s24, %s3349_s23 }
 0x94d   : > { %p2669_p4 = scmp.lt.s32.totalorder %s2667_s3, %s2663_s22 }
 0x94e   : > { %p2665_p11 = pnand %p2664_p10, %p3350_p0 }
 0x94f   : > { %p2670_p6 = por %p2669_p4, %p2668_p2 }
 0x950   : > { %p2666_p13 = pneg %p2665_p11 }
 0x952   : > { %p2671_p12 = pnand %p2670_p6, %p2666_p13 }
 0x954   : > { %2674 = shalt.err (!%p2671_p12)
}
 0x955   : > { %s2745_s21 = smov 128   ;;  %s2746_s29 = smov 8  }
 0x956   : > { %2441 = dma.vmem_to_hbm [thread:$0]  (%p3350_p0), %s3259_s25, 256, %s3256_s24, %s1995_s20, %s2745_s21, %s2745_s21, %s2746_s29  }
 0x957 PF: > { %s3351_s26 = sld [smem:[#allocation17_spill]]  ;;  %p3354_p3 = scmp.ge.s32.totalorder %s2725_s16, 2 }
 0x958   : > { %s3352_s15 = sld [smem:[#allocation19_spill]] }
 0x95d   : > { %s2023_s17 = sand.u32 1, %s3351_s26  }
 0x95e   : > { %p3353_p5 = scmp.ne.s32.totalorder %s3352_s15, 0  ;;  %s2024_s22 = scalar_lea.sflag [#allocation6], %s2023_s17 }
 0x960   : > { %p2458_p7 = pnand %p3354_p3, %p3353_p5 }
 0x962   : > { %p2459_p9 = pneg %p2458_p7 }
 0x964   : > { %2708 = dma.done.wait (%p2459_p9), %s2024_s22, 256  }
 0x965   : > { %2710 = vsyncadd (%p2459_p9), %s2024_s22, 4294967040  ;;  %s3355_s8 = sld [smem:[#allocation18_spill]]  ;;  %p29_p1 = scmp.ge.s32.totalorder %s2902_s14, 4  }
 0x966   : > { %s3356_s15 = sld [smem:[#allocation20_spill]]  ;;  %s3357_s29 = smov %s2717_s30 }
 0x967   : > { %s3359_s16 = smov %s2902_s14  ;;  %31 = sbr.rel (!%p29_p1) target bundleno = 12 (0xc), region = 164 }
 0x96b   : > { %s3358_s30 = smov %s3355_s8 }
 0x96c   :  { %2029 = vsyncpa [#allocation5], 1 }
 0x96d   :  { %2031 = vsyncpa [#allocation5 + $0x1], 1 }
 0x96e   :  { %2032 = vsyncpa [#allocation8], 1 }
 0x96f   :  { %2033 = vsyncpa [#allocation11], 1 }
 0x970   :  { %2034 = vsyncpa [#allocation6], 1 }
 0x971   :  { %2036 = vsyncpa [#allocation6 + $0x1], 1 }

</bundles_post_ra>
